<compile_context>
chip_gen: v6e
topology: v6e:2x2x1
jax: 0.10.0
libtpu: 0.0.40
codegen_flags: <defaults>
</compile_context>

<pallas_src>
import functools

import jax
import jax.numpy as jnp
from jax.experimental import pallas as pl
from jax.experimental.pallas import tpu as pltpu


def _round_up(x: int, m: int) -> int:
    return ((x + m - 1) // m) * m


def _embed_gather_kernel(tok_ref, w_hbm_ref, out_ref, row_buf_ref, sems,
                         *, block_tokens: int):
    """Gather `block_tokens` rows of W_E (HBM resident) into one dense tile.

    tok_ref:     (n_pad,) int32 token ids in SMEM (scalar prefetch, clamped).
    w_hbm_ref:   full W_E left in HBM (memory_space=pl.ANY).
    out_ref:     (block_tokens, d_model) VMEM output tile (auto-pipelined).
    row_buf_ref: (2, block_tokens, d_model) VMEM double-buffered row landing pad.
    sems:        (2, block_tokens) DMA semaphores, one per in-flight row copy.
    """
    i = pl.program_id(0)
    n_steps = pl.num_programs(0)

    def issue_block(block_idx, slot):
        base = block_idx * block_tokens
        for r in range(block_tokens):
            tok = tok_ref[base + r]
            pltpu.make_async_copy(
                w_hbm_ref.at[pl.ds(tok, 1)],          # (1, d_model) row in HBM
                row_buf_ref.at[slot, pl.ds(r, 1)],    # (1, d_model) row in VMEM
                sems.at[slot, r],
            ).start()

    # Prime the pipeline: the very first block issues its own gathers.
    @pl.when(i == 0)
    def _():
        issue_block(0, 0)

    # Prefetch the NEXT block's rows into the other slot while this block's
    # gathers are still in flight (slot (i+1)%2 was fully consumed at step i-1).
    @pl.when(i + 1 < n_steps)
    def _():
        issue_block(i + 1, (i + 1) % 2)

    # Wait for the current block's rows (issued at step i-1, or just above for
    # step 0).  Dummy same-shaped descriptors are the documented wait pattern.
    slot = i % 2
    for r in range(block_tokens):
        pltpu.make_async_copy(
            w_hbm_ref.at[pl.ds(0, 1)],
            row_buf_ref.at[slot, pl.ds(r, 1)],
            sems.at[slot, r],
        ).wait()

    # Single dense (block_tokens, d_model) store -> unmasked full-vreg stores
    # and one dense writeback DMA per grid step (overlaps next block's gathers).
    out_ref[...] = row_buf_ref[slot]


def embed(tokens: jax.Array, W_E: jax.Array, *, block_tokens: int = 64) -> jax.Array:
    """Pallas equivalent of Embed.forward: W_E[tokens, :]."""
    batch, pos = tokens.shape
    d_vocab, d_model = W_E.shape
    n = batch * pos

    # Clamp token ids so the DMA source index can never go out of bounds.
    tokens_flat = jnp.clip(tokens.reshape(-1).astype(jnp.int32), 0, d_vocab - 1)

    # Token-block size: sublane dense (multiple of 16 covers f32 and bf16),
    # capped so tiny inputs don't over-pad.
    tb = min(block_tokens, _round_up(n, 16))
    tb = _round_up(tb, 16)
    n_pad = _round_up(n, tb)
    if n_pad != n:
        # Pad with token 0 (valid row); padded rows are sliced off below.
        tokens_flat = jnp.pad(tokens_flat, (0, n_pad - n))

    itemsize = jnp.dtype(W_E.dtype).itemsize
    kernel = functools.partial(_embed_gather_kernel, block_tokens=tb)

    out_flat = pl.pallas_call(
        kernel,
        out_shape=jax.ShapeDtypeStruct((n_pad, d_model), W_E.dtype),
        grid_spec=pltpu.PrefetchScalarGridSpec(
            num_scalar_prefetch=1,            # tokens_flat lands in SMEM
            grid=(n_pad // tb,),              # one grid step per tb tokens
            in_specs=[
                pl.BlockSpec(memory_space=pl.ANY),   # W_E stays in HBM
            ],
            out_specs=pl.BlockSpec((tb, d_model), lambda i, tok: (i, 0)),
            scratch_shapes=[
                pltpu.VMEM((2, tb, d_model), W_E.dtype),   # double-buffered rows
                pltpu.SemaphoreType.DMA((2, tb)),
            ],
        ),
        compiler_params=pltpu.CompilerParams(
            # The cross-step prefetch carries state in scratch, so the grid
            # axis must execute sequentially on one core.
            dimension_semantics=("arbitrary",),
        ),
        cost_estimate=pl.CostEstimate(
            flops=0,
            transcendentals=0,
            bytes_accessed=2 * n_pad * d_model * itemsize,
        ),
    )(tokens_flat, W_E)

    return out_flat[:n].reshape(batch, pos, d_model)


if __name__ == "__main__":
    key = jax.random.PRNGKey(0)
    k_w, k_t, k_w2, k_t2, k_w3, k_t3 = jax.random.split(key, 6)

    # --- Test 1: small config, single grid step, f32 -------------------------
    batch, pos = 2, 8
    d_vocab, d_model = 64, 128
    W_E = jax.random.normal(k_w, (d_vocab, d_model), dtype=jnp.float32) * 0.02
    tokens = jax.random.randint(k_t, (batch, pos), 0, d_vocab, dtype=jnp.int32)

    out = jax.block_until_ready(embed(tokens, W_E))
    ref = W_E[tokens, :]
    assert out.shape == (batch, pos, d_model)
    assert out.dtype == W_E.dtype
    assert jnp.array_equal(out, ref), "Pallas embed mismatch vs reference (f32)"

    # --- Test 2: multi-step grid + tail padding, bf16 -------------------------
    batch2, pos2 = 2, 40                      # n=80 -> tb=64, grid=2, pad=48
    d_vocab2, d_model2 = 50, 128
    W_E2 = (jax.random.normal(k_w2, (d_vocab2, d_model2), dtype=jnp.float32)
            * 0.02).astype(jnp.bfloat16)
    tokens2 = jax.random.randint(k_t2, (batch2, pos2), 0, d_vocab2, dtype=jnp.int32)

    out2 = jax.block_until_ready(embed(tokens2, W_E2))
    ref2 = W_E2[tokens2, :]
    assert out2.shape == (batch2, pos2, d_model2)
    assert out2.dtype == jnp.bfloat16
    assert jnp.array_equal(out2, ref2), "Pallas embed mismatch vs reference (bf16)"

    # --- Test 3: longer grid (steady-state prefetch), f32 ---------------------
    batch3, pos3 = 4, 64                      # n=256 -> tb=64, grid=4
    d_vocab3, d_model3 = 96, 256
    W_E3 = jax.random.normal(k_w3, (d_vocab3, d_model3), dtype=jnp.float32) * 0.02
    tokens3 = jax.random.randint(k_t3, (batch3, pos3), 0, d_vocab3, dtype=jnp.int32)

    out3 = jax.block_until_ready(embed(tokens3, W_E3))
    ref3 = W_E3[tokens3, :]
    assert out3.shape == (batch3, pos3, d_model3)
    assert jnp.array_equal(out3, ref3), "Pallas embed mismatch vs reference (multi-step)"

    print("KERNEL_OK")
</pallas_src>

<mosaic_0001>
module attributes {stable_mosaic.version = 11 : i64} {
  func.func @_embed_gather_kernel(%arg0: i32, %arg1: memref<16xi32, #tpu.memory_space<smem>>, %arg2: memref<64x128xf32, #tpu.memory_space<any>>, %arg3: memref<16x128xf32, #tpu.memory_space<vmem>>, %arg4: memref<2x16x128xf32, #tpu.memory_space<vmem>>, %arg5: memref<2x16x!tpu.dma_semaphore, #tpu.memory_space<semaphore_mem>>) attributes {dimension_semantics = [#tpu.dimension_semantics<arbitrary>], iteration_bounds = array<i64: 1>, scalar_prefetch = 1 : i64, scratch_operands = 2 : i64, tpu.core_type = #tpu.core_type<tc>, window_params = [{}, {transform_indices = @transform_1, window_bounds = array<i64: 16, 128>}]} {
    %c0_i32 = arith.constant 0 : i32
    %0 = arith.cmpi eq, %arg0, %c0_i32 : i32
    %1 = arith.extui %0 : i1 to i32
    %c0_i32_0 = arith.constant 0 : i32
    %2 = arith.cmpi ne, %1, %c0_i32_0 : i32
    scf.if %2 {
      %c0_78 = arith.constant 0 : index
      %101 = memref.load %arg1[%c0_78] : memref<16xi32, #tpu.memory_space<smem>>
      %c0_i32_79 = arith.constant 0 : i32
      %c0_i32_80 = arith.constant 0 : i32
      %c0_i32_81 = arith.constant 0 : i32
      %c0_i32_82 = arith.constant 0 : i32
      %102 = tpu.memref_slice %arg2[%101, %c0_i32_82] : memref<64x128xf32, #tpu.memory_space<any>> -> memref<1x128xf32, #tpu.memory_space<any>>
      %c0_i32_83 = arith.constant 0 : i32
      %c0_i32_84 = arith.constant 0 : i32
      %103 = tpu.memref_slice %arg4[%c0_i32_79, %c0_i32_83, %c0_i32_84] : memref<2x16x128xf32, #tpu.memory_space<vmem>> -> memref<1x1x128xf32, #tpu.memory_space<vmem>>
      %104 = tpu.memref_squeeze %103 : memref<1x1x128xf32, #tpu.memory_space<vmem>> -> memref<1x128xf32, #tpu.memory_space<vmem>>
      %105 = tpu.memref_slice %arg5[%c0_i32_80, %c0_i32_81] : memref<2x16x!tpu.dma_semaphore, #tpu.memory_space<semaphore_mem>> -> memref<1x1x!tpu.dma_semaphore, #tpu.memory_space<semaphore_mem>>
      %106 = tpu.memref_squeeze %105 : memref<1x1x!tpu.dma_semaphore, #tpu.memory_space<semaphore_mem>> -> memref<!tpu.dma_semaphore, #tpu.memory_space<semaphore_mem>>
      tpu.enqueue_dma source(%102 : memref<1x128xf32, #tpu.memory_space<any>>) target(%104 : memref<1x128xf32, #tpu.memory_space<vmem>>) target_semaphore(%106 : memref<!tpu.dma_semaphore, #tpu.memory_space<semaphore_mem>>)
      %c1 = arith.constant 1 : index
      %107 = memref.load %arg1[%c1] : memref<16xi32, #tpu.memory_space<smem>>
      %c0_i32_85 = arith.constant 0 : i32
      %c0_i32_86 = arith.constant 0 : i32
      %c1_i32_87 = arith.constant 1 : i32
      %c0_i32_88 = arith.constant 0 : i32
      %108 = tpu.memref_slice %arg2[%107, %c0_i32_88] : memref<64x128xf32, #tpu.memory_space<any>> -> memref<1x128xf32, #tpu.memory_space<any>>
      %c1_i32_89 = arith.constant 1 : i32
      %c0_i32_90 = arith.constant 0 : i32
      %109 = tpu.memref_slice %arg4[%c0_i32_85, %c1_i32_89, %c0_i32_90] : memref<2x16x128xf32, #tpu.memory_space<vmem>> -> memref<1x1x128xf32, #tpu.memory_space<vmem>>
      %110 = tpu.memref_squeeze %109 : memref<1x1x128xf32, #tpu.memory_space<vmem>> -> memref<1x128xf32, #tpu.memory_space<vmem>>
      %111 = tpu.memref_slice %arg5[%c0_i32_86, %c1_i32_87] : memref<2x16x!tpu.dma_semaphore, #tpu.memory_space<semaphore_mem>> -> memref<1x1x!tpu.dma_semaphore, #tpu.memory_space<semaphore_mem>>
      %112 = tpu.memref_squeeze %111 : memref<1x1x!tpu.dma_semaphore, #tpu.memory_space<semaphore_mem>> -> memref<!tpu.dma_semaphore, #tpu.memory_space<semaphore_mem>>
      tpu.enqueue_dma source(%108 : memref<1x128xf32, #tpu.memory_space<any>>) target(%110 : memref<1x128xf32, #tpu.memory_space<vmem>>) target_semaphore(%112 : memref<!tpu.dma_semaphore, #tpu.memory_space<semaphore_mem>>)
      %c2 = arith.constant 2 : index
      %113 = memref.load %arg1[%c2] : memref<16xi32, #tpu.memory_space<smem>>
      %c0_i32_91 = arith.constant 0 : i32
      %c0_i32_92 = arith.constant 0 : i32
      %c2_i32_93 = arith.constant 2 : i32
      %c0_i32_94 = arith.constant 0 : i32
      %114 = tpu.memref_slice %arg2[%113, %c0_i32_94] : memref<64x128xf32, #tpu.memory_space<any>> -> memref<1x128xf32, #tpu.memory_space<any>>
      %c2_i32_95 = arith.constant 2 : i32
      %c0_i32_96 = arith.constant 0 : i32
      %115 = tpu.memref_slice %arg4[%c0_i32_91, %c2_i32_95, %c0_i32_96] : memref<2x16x128xf32, #tpu.memory_space<vmem>> -> memref<1x1x128xf32, #tpu.memory_space<vmem>>
      %116 = tpu.memref_squeeze %115 : memref<1x1x128xf32, #tpu.memory_space<vmem>> -> memref<1x128xf32, #tpu.memory_space<vmem>>
      %117 = tpu.memref_slice %arg5[%c0_i32_92, %c2_i32_93] : memref<2x16x!tpu.dma_semaphore, #tpu.memory_space<semaphore_mem>> -> memref<1x1x!tpu.dma_semaphore, #tpu.memory_space<semaphore_mem>>
      %118 = tpu.memref_squeeze %117 : memref<1x1x!tpu.dma_semaphore, #tpu.memory_space<semaphore_mem>> -> memref<!tpu.dma_semaphore, #tpu.memory_space<semaphore_mem>>
      tpu.enqueue_dma source(%114 : memref<1x128xf32, #tpu.memory_space<any>>) target(%116 : memref<1x128xf32, #tpu.memory_space<vmem>>) target_semaphore(%118 : memref<!tpu.dma_semaphore, #tpu.memory_space<semaphore_mem>>)
      %c3 = arith.constant 3 : index
      %119 = memref.load %arg1[%c3] : memref<16xi32, #tpu.memory_space<smem>>
      %c0_i32_97 = arith.constant 0 : i32
      %c0_i32_98 = arith.constant 0 : i32
      %c3_i32_99 = arith.constant 3 : i32
      %c0_i32_100 = arith.constant 0 : i32
      %120 = tpu.memref_slice %arg2[%119, %c0_i32_100] : memref<64x128xf32, #tpu.memory_space<any>> -> memref<1x128xf32, #tpu.memory_space<any>>
      %c3_i32_101 = arith.constant 3 : i32
      %c0_i32_102 = arith.constant 0 : i32
      %121 = tpu.memref_slice %arg4[%c0_i32_97, %c3_i32_101, %c0_i32_102] : memref<2x16x128xf32, #tpu.memory_space<vmem>> -> memref<1x1x128xf32, #tpu.memory_space<vmem>>
      %122 = tpu.memref_squeeze %121 : memref<1x1x128xf32, #tpu.memory_space<vmem>> -> memref<1x128xf32, #tpu.memory_space<vmem>>
      %123 = tpu.memref_slice %arg5[%c0_i32_98, %c3_i32_99] : memref<2x16x!tpu.dma_semaphore, #tpu.memory_space<semaphore_mem>> -> memref<1x1x!tpu.dma_semaphore, #tpu.memory_space<semaphore_mem>>
      %124 = tpu.memref_squeeze %123 : memref<1x1x!tpu.dma_semaphore, #tpu.memory_space<semaphore_mem>> -> memref<!tpu.dma_semaphore, #tpu.memory_space<semaphore_mem>>
      tpu.enqueue_dma source(%120 : memref<1x128xf32, #tpu.memory_space<any>>) target(%122 : memref<1x128xf32, #tpu.memory_space<vmem>>) target_semaphore(%124 : memref<!tpu.dma_semaphore, #tpu.memory_space<semaphore_mem>>)
      %c4 = arith.constant 4 : index
      %125 = memref.load %arg1[%c4] : memref<16xi32, #tpu.memory_space<smem>>
      %c0_i32_103 = arith.constant 0 : i32
      %c0_i32_104 = arith.constant 0 : i32
      %c4_i32_105 = arith.constant 4 : i32
      %c0_i32_106 = arith.constant 0 : i32
      %126 = tpu.memref_slice %arg2[%125, %c0_i32_106] : memref<64x128xf32, #tpu.memory_space<any>> -> memref<1x128xf32, #tpu.memory_space<any>>
      %c4_i32_107 = arith.constant 4 : i32
      %c0_i32_108 = arith.constant 0 : i32
      %127 = tpu.memref_slice %arg4[%c0_i32_103, %c4_i32_107, %c0_i32_108] : memref<2x16x128xf32, #tpu.memory_space<vmem>> -> memref<1x1x128xf32, #tpu.memory_space<vmem>>
      %128 = tpu.memref_squeeze %127 : memref<1x1x128xf32, #tpu.memory_space<vmem>> -> memref<1x128xf32, #tpu.memory_space<vmem>>
      %129 = tpu.memref_slice %arg5[%c0_i32_104, %c4_i32_105] : memref<2x16x!tpu.dma_semaphore, #tpu.memory_space<semaphore_mem>> -> memref<1x1x!tpu.dma_semaphore, #tpu.memory_space<semaphore_mem>>
      %130 = tpu.memref_squeeze %129 : memref<1x1x!tpu.dma_semaphore, #tpu.memory_space<semaphore_mem>> -> memref<!tpu.dma_semaphore, #tpu.memory_space<semaphore_mem>>
      tpu.enqueue_dma source(%126 : memref<1x128xf32, #tpu.memory_space<any>>) target(%128 : memref<1x128xf32, #tpu.memory_space<vmem>>) target_semaphore(%130 : memref<!tpu.dma_semaphore, #tpu.memory_space<semaphore_mem>>)
      %c5 = arith.constant 5 : index
      %131 = memref.load %arg1[%c5] : memref<16xi32, #tpu.memory_space<smem>>
      %c0_i32_109 = arith.constant 0 : i32
      %c0_i32_110 = arith.constant 0 : i32
      %c5_i32_111 = arith.constant 5 : i32
      %c0_i32_112 = arith.constant 0 : i32
      %132 = tpu.memref_slice %arg2[%131, %c0_i32_112] : memref<64x128xf32, #tpu.memory_space<any>> -> memref<1x128xf32, #tpu.memory_space<any>>
      %c5_i32_113 = arith.constant 5 : i32
      %c0_i32_114 = arith.constant 0 : i32
      %133 = tpu.memref_slice %arg4[%c0_i32_109, %c5_i32_113, %c0_i32_114] : memref<2x16x128xf32, #tpu.memory_space<vmem>> -> memref<1x1x128xf32, #tpu.memory_space<vmem>>
      %134 = tpu.memref_squeeze %133 : memref<1x1x128xf32, #tpu.memory_space<vmem>> -> memref<1x128xf32, #tpu.memory_space<vmem>>
      %135 = tpu.memref_slice %arg5[%c0_i32_110, %c5_i32_111] : memref<2x16x!tpu.dma_semaphore, #tpu.memory_space<semaphore_mem>> -> memref<1x1x!tpu.dma_semaphore, #tpu.memory_space<semaphore_mem>>
      %136 = tpu.memref_squeeze %135 : memref<1x1x!tpu.dma_semaphore, #tpu.memory_space<semaphore_mem>> -> memref<!tpu.dma_semaphore, #tpu.memory_space<semaphore_mem>>
      tpu.enqueue_dma source(%132 : memref<1x128xf32, #tpu.memory_space<any>>) target(%134 : memref<1x128xf32, #tpu.memory_space<vmem>>) target_semaphore(%136 : memref<!tpu.dma_semaphore, #tpu.memory_space<semaphore_mem>>)
      %c6 = arith.constant 6 : index
      %137 = memref.load %arg1[%c6] : memref<16xi32, #tpu.memory_space<smem>>
      %c0_i32_115 = arith.constant 0 : i32
      %c0_i32_116 = arith.constant 0 : i32
      %c6_i32_117 = arith.constant 6 : i32
      %c0_i32_118 = arith.constant 0 : i32
      %138 = tpu.memref_slice %arg2[%137, %c0_i32_118] : memref<64x128xf32, #tpu.memory_space<any>> -> memref<1x128xf32, #tpu.memory_space<any>>
      %c6_i32_119 = arith.constant 6 : i32
      %c0_i32_120 = arith.constant 0 : i32
      %139 = tpu.memref_slice %arg4[%c0_i32_115, %c6_i32_119, %c0_i32_120] : memref<2x16x128xf32, #tpu.memory_space<vmem>> -> memref<1x1x128xf32, #tpu.memory_space<vmem>>
      %140 = tpu.memref_squeeze %139 : memref<1x1x128xf32, #tpu.memory_space<vmem>> -> memref<1x128xf32, #tpu.memory_space<vmem>>
      %141 = tpu.memref_slice %arg5[%c0_i32_116, %c6_i32_117] : memref<2x16x!tpu.dma_semaphore, #tpu.memory_space<semaphore_mem>> -> memref<1x1x!tpu.dma_semaphore, #tpu.memory_space<semaphore_mem>>
      %142 = tpu.memref_squeeze %141 : memref<1x1x!tpu.dma_semaphore, #tpu.memory_space<semaphore_mem>> -> memref<!tpu.dma_semaphore, #tpu.memory_space<semaphore_mem>>
      tpu.enqueue_dma source(%138 : memref<1x128xf32, #tpu.memory_space<any>>) target(%140 : memref<1x128xf32, #tpu.memory_space<vmem>>) target_semaphore(%142 : memref<!tpu.dma_semaphore, #tpu.memory_space<semaphore_mem>>)
      %c7 = arith.constant 7 : index
      %143 = memref.load %arg1[%c7] : memref<16xi32, #tpu.memory_space<smem>>
      %c0_i32_121 = arith.constant 0 : i32
      %c0_i32_122 = arith.constant 0 : i32
      %c7_i32_123 = arith.constant 7 : i32
      %c0_i32_124 = arith.constant 0 : i32
      %144 = tpu.memref_slice %arg2[%143, %c0_i32_124] : memref<64x128xf32, #tpu.memory_space<any>> -> memref<1x128xf32, #tpu.memory_space<any>>
      %c7_i32_125 = arith.constant 7 : i32
      %c0_i32_126 = arith.constant 0 : i32
      %145 = tpu.memref_slice %arg4[%c0_i32_121, %c7_i32_125, %c0_i32_126] : memref<2x16x128xf32, #tpu.memory_space<vmem>> -> memref<1x1x128xf32, #tpu.memory_space<vmem>>
      %146 = tpu.memref_squeeze %145 : memref<1x1x128xf32, #tpu.memory_space<vmem>> -> memref<1x128xf32, #tpu.memory_space<vmem>>
      %147 = tpu.memref_slice %arg5[%c0_i32_122, %c7_i32_123] : memref<2x16x!tpu.dma_semaphore, #tpu.memory_space<semaphore_mem>> -> memref<1x1x!tpu.dma_semaphore, #tpu.memory_space<semaphore_mem>>
      %148 = tpu.memref_squeeze %147 : memref<1x1x!tpu.dma_semaphore, #tpu.memory_space<semaphore_mem>> -> memref<!tpu.dma_semaphore, #tpu.memory_space<semaphore_mem>>
      tpu.enqueue_dma source(%144 : memref<1x128xf32, #tpu.memory_space<any>>) target(%146 : memref<1x128xf32, #tpu.memory_space<vmem>>) target_semaphore(%148 : memref<!tpu.dma_semaphore, #tpu.memory_space<semaphore_mem>>)
      %c8 = arith.constant 8 : index
      %149 = memref.load %arg1[%c8] : memref<16xi32, #tpu.memory_space<smem>>
      %c0_i32_127 = arith.constant 0 : i32
      %c0_i32_128 = arith.constant 0 : i32
      %c8_i32_129 = arith.constant 8 : i32
      %c0_i32_130 = arith.constant 0 : i32
      %150 = tpu.memref_slice %arg2[%149, %c0_i32_130] : memref<64x128xf32, #tpu.memory_space<any>> -> memref<1x128xf32, #tpu.memory_space<any>>
      %c8_i32_131 = arith.constant 8 : i32
      %c0_i32_132 = arith.constant 0 : i32
      %151 = tpu.memref_slice %arg4[%c0_i32_127, %c8_i32_131, %c0_i32_132] : memref<2x16x128xf32, #tpu.memory_space<vmem>> -> memref<1x1x128xf32, #tpu.memory_space<vmem>>
      %152 = tpu.memref_squeeze %151 : memref<1x1x128xf32, #tpu.memory_space<vmem>> -> memref<1x128xf32, #tpu.memory_space<vmem>>
      %153 = tpu.memref_slice %arg5[%c0_i32_128, %c8_i32_129] : memref<2x16x!tpu.dma_semaphore, #tpu.memory_space<semaphore_mem>> -> memref<1x1x!tpu.dma_semaphore, #tpu.memory_space<semaphore_mem>>
      %154 = tpu.memref_squeeze %153 : memref<1x1x!tpu.dma_semaphore, #tpu.memory_space<semaphore_mem>> -> memref<!tpu.dma_semaphore, #tpu.memory_space<semaphore_mem>>
      tpu.enqueue_dma source(%150 : memref<1x128xf32, #tpu.memory_space<any>>) target(%152 : memref<1x128xf32, #tpu.memory_space<vmem>>) target_semaphore(%154 : memref<!tpu.dma_semaphore, #tpu.memory_space<semaphore_mem>>)
      %c9 = arith.constant 9 : index
      %155 = memref.load %arg1[%c9] : memref<16xi32, #tpu.memory_space<smem>>
      %c0_i32_133 = arith.constant 0 : i32
      %c0_i32_134 = arith.constant 0 : i32
      %c9_i32_135 = arith.constant 9 : i32
      %c0_i32_136 = arith.constant 0 : i32
      %156 = tpu.memref_slice %arg2[%155, %c0_i32_136] : memref<64x128xf32, #tpu.memory_space<any>> -> memref<1x128xf32, #tpu.memory_space<any>>
      %c9_i32_137 = arith.constant 9 : i32
      %c0_i32_138 = arith.constant 0 : i32
      %157 = tpu.memref_slice %arg4[%c0_i32_133, %c9_i32_137, %c0_i32_138] : memref<2x16x128xf32, #tpu.memory_space<vmem>> -> memref<1x1x128xf32, #tpu.memory_space<vmem>>
      %158 = tpu.memref_squeeze %157 : memref<1x1x128xf32, #tpu.memory_space<vmem>> -> memref<1x128xf32, #tpu.memory_space<vmem>>
      %159 = tpu.memref_slice %arg5[%c0_i32_134, %c9_i32_135] : memref<2x16x!tpu.dma_semaphore, #tpu.memory_space<semaphore_mem>> -> memref<1x1x!tpu.dma_semaphore, #tpu.memory_space<semaphore_mem>>
      %160 = tpu.memref_squeeze %159 : memref<1x1x!tpu.dma_semaphore, #tpu.memory_space<semaphore_mem>> -> memref<!tpu.dma_semaphore, #tpu.memory_space<semaphore_mem>>
      tpu.enqueue_dma source(%156 : memref<1x128xf32, #tpu.memory_space<any>>) target(%158 : memref<1x128xf32, #tpu.memory_space<vmem>>) target_semaphore(%160 : memref<!tpu.dma_semaphore, #tpu.memory_space<semaphore_mem>>)
      %c10 = arith.constant 10 : index
      %161 = memref.load %arg1[%c10] : memref<16xi32, #tpu.memory_space<smem>>
      %c0_i32_139 = arith.constant 0 : i32
      %c0_i32_140 = arith.constant 0 : i32
      %c10_i32_141 = arith.constant 10 : i32
      %c0_i32_142 = arith.constant 0 : i32
      %162 = tpu.memref_slice %arg2[%161, %c0_i32_142] : memref<64x128xf32, #tpu.memory_space<any>> -> memref<1x128xf32, #tpu.memory_space<any>>
      %c10_i32_143 = arith.constant 10 : i32
      %c0_i32_144 = arith.constant 0 : i32
      %163 = tpu.memref_slice %arg4[%c0_i32_139, %c10_i32_143, %c0_i32_144] : memref<2x16x128xf32, #tpu.memory_space<vmem>> -> memref<1x1x128xf32, #tpu.memory_space<vmem>>
      %164 = tpu.memref_squeeze %163 : memref<1x1x128xf32, #tpu.memory_space<vmem>> -> memref<1x128xf32, #tpu.memory_space<vmem>>
      %165 = tpu.memref_slice %arg5[%c0_i32_140, %c10_i32_141] : memref<2x16x!tpu.dma_semaphore, #tpu.memory_space<semaphore_mem>> -> memref<1x1x!tpu.dma_semaphore, #tpu.memory_space<semaphore_mem>>
      %166 = tpu.memref_squeeze %165 : memref<1x1x!tpu.dma_semaphore, #tpu.memory_space<semaphore_mem>> -> memref<!tpu.dma_semaphore, #tpu.memory_space<semaphore_mem>>
      tpu.enqueue_dma source(%162 : memref<1x128xf32, #tpu.memory_space<any>>) target(%164 : memref<1x128xf32, #tpu.memory_space<vmem>>) target_semaphore(%166 : memref<!tpu.dma_semaphore, #tpu.memory_space<semaphore_mem>>)
      %c11 = arith.constant 11 : index
      %167 = memref.load %arg1[%c11] : memref<16xi32, #tpu.memory_space<smem>>
      %c0_i32_145 = arith.constant 0 : i32
      %c0_i32_146 = arith.constant 0 : i32
      %c11_i32_147 = arith.constant 11 : i32
      %c0_i32_148 = arith.constant 0 : i32
      %168 = tpu.memref_slice %arg2[%167, %c0_i32_148] : memref<64x128xf32, #tpu.memory_space<any>> -> memref<1x128xf32, #tpu.memory_space<any>>
      %c11_i32_149 = arith.constant 11 : i32
      %c0_i32_150 = arith.constant 0 : i32
      %169 = tpu.memref_slice %arg4[%c0_i32_145, %c11_i32_149, %c0_i32_150] : memref<2x16x128xf32, #tpu.memory_space<vmem>> -> memref<1x1x128xf32, #tpu.memory_space<vmem>>
      %170 = tpu.memref_squeeze %169 : memref<1x1x128xf32, #tpu.memory_space<vmem>> -> memref<1x128xf32, #tpu.memory_space<vmem>>
      %171 = tpu.memref_slice %arg5[%c0_i32_146, %c11_i32_147] : memref<2x16x!tpu.dma_semaphore, #tpu.memory_space<semaphore_mem>> -> memref<1x1x!tpu.dma_semaphore, #tpu.memory_space<semaphore_mem>>
      %172 = tpu.memref_squeeze %171 : memref<1x1x!tpu.dma_semaphore, #tpu.memory_space<semaphore_mem>> -> memref<!tpu.dma_semaphore, #tpu.memory_space<semaphore_mem>>
      tpu.enqueue_dma source(%168 : memref<1x128xf32, #tpu.memory_space<any>>) target(%170 : memref<1x128xf32, #tpu.memory_space<vmem>>) target_semaphore(%172 : memref<!tpu.dma_semaphore, #tpu.memory_space<semaphore_mem>>)
      %c12 = arith.constant 12 : index
      %173 = memref.load %arg1[%c12] : memref<16xi32, #tpu.memory_space<smem>>
      %c0_i32_151 = arith.constant 0 : i32
      %c0_i32_152 = arith.constant 0 : i32
      %c12_i32_153 = arith.constant 12 : i32
      %c0_i32_154 = arith.constant 0 : i32
      %174 = tpu.memref_slice %arg2[%173, %c0_i32_154] : memref<64x128xf32, #tpu.memory_space<any>> -> memref<1x128xf32, #tpu.memory_space<any>>
      %c12_i32_155 = arith.constant 12 : i32
      %c0_i32_156 = arith.constant 0 : i32
      %175 = tpu.memref_slice %arg4[%c0_i32_151, %c12_i32_155, %c0_i32_156] : memref<2x16x128xf32, #tpu.memory_space<vmem>> -> memref<1x1x128xf32, #tpu.memory_space<vmem>>
      %176 = tpu.memref_squeeze %175 : memref<1x1x128xf32, #tpu.memory_space<vmem>> -> memref<1x128xf32, #tpu.memory_space<vmem>>
      %177 = tpu.memref_slice %arg5[%c0_i32_152, %c12_i32_153] : memref<2x16x!tpu.dma_semaphore, #tpu.memory_space<semaphore_mem>> -> memref<1x1x!tpu.dma_semaphore, #tpu.memory_space<semaphore_mem>>
      %178 = tpu.memref_squeeze %177 : memref<1x1x!tpu.dma_semaphore, #tpu.memory_space<semaphore_mem>> -> memref<!tpu.dma_semaphore, #tpu.memory_space<semaphore_mem>>
      tpu.enqueue_dma source(%174 : memref<1x128xf32, #tpu.memory_space<any>>) target(%176 : memref<1x128xf32, #tpu.memory_space<vmem>>) target_semaphore(%178 : memref<!tpu.dma_semaphore, #tpu.memory_space<semaphore_mem>>)
      %c13 = arith.constant 13 : index
      %179 = memref.load %arg1[%c13] : memref<16xi32, #tpu.memory_space<smem>>
      %c0_i32_157 = arith.constant 0 : i32
      %c0_i32_158 = arith.constant 0 : i32
      %c13_i32_159 = arith.constant 13 : i32
      %c0_i32_160 = arith.constant 0 : i32
      %180 = tpu.memref_slice %arg2[%179, %c0_i32_160] : memref<64x128xf32, #tpu.memory_space<any>> -> memref<1x128xf32, #tpu.memory_space<any>>
      %c13_i32_161 = arith.constant 13 : i32
      %c0_i32_162 = arith.constant 0 : i32
      %181 = tpu.memref_slice %arg4[%c0_i32_157, %c13_i32_161, %c0_i32_162] : memref<2x16x128xf32, #tpu.memory_space<vmem>> -> memref<1x1x128xf32, #tpu.memory_space<vmem>>
      %182 = tpu.memref_squeeze %181 : memref<1x1x128xf32, #tpu.memory_space<vmem>> -> memref<1x128xf32, #tpu.memory_space<vmem>>
      %183 = tpu.memref_slice %arg5[%c0_i32_158, %c13_i32_159] : memref<2x16x!tpu.dma_semaphore, #tpu.memory_space<semaphore_mem>> -> memref<1x1x!tpu.dma_semaphore, #tpu.memory_space<semaphore_mem>>
      %184 = tpu.memref_squeeze %183 : memref<1x1x!tpu.dma_semaphore, #tpu.memory_space<semaphore_mem>> -> memref<!tpu.dma_semaphore, #tpu.memory_space<semaphore_mem>>
      tpu.enqueue_dma source(%180 : memref<1x128xf32, #tpu.memory_space<any>>) target(%182 : memref<1x128xf32, #tpu.memory_space<vmem>>) target_semaphore(%184 : memref<!tpu.dma_semaphore, #tpu.memory_space<semaphore_mem>>)
      %c14 = arith.constant 14 : index
      %185 = memref.load %arg1[%c14] : memref<16xi32, #tpu.memory_space<smem>>
      %c0_i32_163 = arith.constant 0 : i32
      %c0_i32_164 = arith.constant 0 : i32
      %c14_i32_165 = arith.constant 14 : i32
      %c0_i32_166 = arith.constant 0 : i32
      %186 = tpu.memref_slice %arg2[%185, %c0_i32_166] : memref<64x128xf32, #tpu.memory_space<any>> -> memref<1x128xf32, #tpu.memory_space<any>>
      %c14_i32_167 = arith.constant 14 : i32
      %c0_i32_168 = arith.constant 0 : i32
      %187 = tpu.memref_slice %arg4[%c0_i32_163, %c14_i32_167, %c0_i32_168] : memref<2x16x128xf32, #tpu.memory_space<vmem>> -> memref<1x1x128xf32, #tpu.memory_space<vmem>>
      %188 = tpu.memref_squeeze %187 : memref<1x1x128xf32, #tpu.memory_space<vmem>> -> memref<1x128xf32, #tpu.memory_space<vmem>>
      %189 = tpu.memref_slice %arg5[%c0_i32_164, %c14_i32_165] : memref<2x16x!tpu.dma_semaphore, #tpu.memory_space<semaphore_mem>> -> memref<1x1x!tpu.dma_semaphore, #tpu.memory_space<semaphore_mem>>
      %190 = tpu.memref_squeeze %189 : memref<1x1x!tpu.dma_semaphore, #tpu.memory_space<semaphore_mem>> -> memref<!tpu.dma_semaphore, #tpu.memory_space<semaphore_mem>>
      tpu.enqueue_dma source(%186 : memref<1x128xf32, #tpu.memory_space<any>>) target(%188 : memref<1x128xf32, #tpu.memory_space<vmem>>) target_semaphore(%190 : memref<!tpu.dma_semaphore, #tpu.memory_space<semaphore_mem>>)
      %c15 = arith.constant 15 : index
      %191 = memref.load %arg1[%c15] : memref<16xi32, #tpu.memory_space<smem>>
      %c0_i32_169 = arith.constant 0 : i32
      %c0_i32_170 = arith.constant 0 : i32
      %c15_i32_171 = arith.constant 15 : i32
      %c0_i32_172 = arith.constant 0 : i32
      %192 = tpu.memref_slice %arg2[%191, %c0_i32_172] : memref<64x128xf32, #tpu.memory_space<any>> -> memref<1x128xf32, #tpu.memory_space<any>>
      %c15_i32_173 = arith.constant 15 : i32
      %c0_i32_174 = arith.constant 0 : i32
      %193 = tpu.memref_slice %arg4[%c0_i32_169, %c15_i32_173, %c0_i32_174] : memref<2x16x128xf32, #tpu.memory_space<vmem>> -> memref<1x1x128xf32, #tpu.memory_space<vmem>>
      %194 = tpu.memref_squeeze %193 : memref<1x1x128xf32, #tpu.memory_space<vmem>> -> memref<1x128xf32, #tpu.memory_space<vmem>>
      %195 = tpu.memref_slice %arg5[%c0_i32_170, %c15_i32_171] : memref<2x16x!tpu.dma_semaphore, #tpu.memory_space<semaphore_mem>> -> memref<1x1x!tpu.dma_semaphore, #tpu.memory_space<semaphore_mem>>
      %196 = tpu.memref_squeeze %195 : memref<1x1x!tpu.dma_semaphore, #tpu.memory_space<semaphore_mem>> -> memref<!tpu.dma_semaphore, #tpu.memory_space<semaphore_mem>>
      tpu.enqueue_dma source(%192 : memref<1x128xf32, #tpu.memory_space<any>>) target(%194 : memref<1x128xf32, #tpu.memory_space<vmem>>) target_semaphore(%196 : memref<!tpu.dma_semaphore, #tpu.memory_space<semaphore_mem>>)
    } else {
    }
    %c1_i32 = arith.constant 1 : i32
    %3 = arith.addi %arg0, %c1_i32 : i32
    %c1_i32_1 = arith.constant 1 : i32
    %4 = arith.cmpi slt, %3, %c1_i32_1 : i32
    %5 = arith.extui %4 : i1 to i32
    %c0_i32_2 = arith.constant 0 : i32
    %6 = arith.cmpi ne, %5, %c0_i32_2 : i32
    scf.if %6 {
      %c1_i32_78 = arith.constant 1 : i32
      %101 = arith.addi %arg0, %c1_i32_78 : i32
      %c1_i32_79 = arith.constant 1 : i32
      %102 = arith.addi %arg0, %c1_i32_79 : i32
      %c2_i32_80 = arith.constant 2 : i32
      %c0_i32_81 = arith.constant 0 : i32
      %103 = arith.cmpi eq, %c2_i32_80, %c0_i32_81 : i32
      %c1_i32_82 = arith.constant 1 : i32
      %104 = arith.select %103, %c1_i32_82, %c2_i32_80 : i32
      %105 = arith.remsi %102, %104 : i32
      %c0_i32_83 = arith.constant 0 : i32
      %106 = arith.cmpi ne, %105, %c0_i32_83 : i32
      %c0_i32_84 = arith.constant 0 : i32
      %107 = arith.cmpi slt, %105, %c0_i32_84 : i32
      %c0_i32_85 = arith.constant 0 : i32
      %108 = arith.cmpi slt, %104, %c0_i32_85 : i32
      %109 = arith.xori %107, %108 : i1
      %110 = arith.andi %109, %106 : i1
      %111 = arith.addi %105, %104 : i32
      %112 = arith.select %110, %111, %105 : i32
      %c16_i32 = arith.constant 16 : i32
      %113 = arith.muli %101, %c16_i32 : i32
      %c0_i32_86 = arith.constant 0 : i32
      %114 = arith.addi %113, %c0_i32_86 : i32
      %115 = arith.index_cast %114 : i32 to index
      %116 = memref.load %arg1[%115] : memref<16xi32, #tpu.memory_space<smem>>
      %c0_i32_87 = arith.constant 0 : i32
      %c0_i32_88 = arith.constant 0 : i32
      %117 = tpu.memref_slice %arg2[%116, %c0_i32_88] : memref<64x128xf32, #tpu.memory_space<any>> -> memref<1x128xf32, #tpu.memory_space<any>>
      %c0_i32_89 = arith.constant 0 : i32
      %c0_i32_90 = arith.constant 0 : i32
      %118 = tpu.memref_slice %arg4[%112, %c0_i32_89, %c0_i32_90] : memref<2x16x128xf32, #tpu.memory_space<vmem>> -> memref<1x1x128xf32, #tpu.memory_space<vmem>>
      %119 = tpu.memref_squeeze %118 : memref<1x1x128xf32, #tpu.memory_space<vmem>> -> memref<1x128xf32, #tpu.memory_space<vmem>>
      %120 = tpu.memref_slice %arg5[%112, %c0_i32_87] : memref<2x16x!tpu.dma_semaphore, #tpu.memory_space<semaphore_mem>> -> memref<1x1x!tpu.dma_semaphore, #tpu.memory_space<semaphore_mem>>
      %121 = tpu.memref_squeeze %120 : memref<1x1x!tpu.dma_semaphore, #tpu.memory_space<semaphore_mem>> -> memref<!tpu.dma_semaphore, #tpu.memory_space<semaphore_mem>>
      tpu.enqueue_dma source(%117 : memref<1x128xf32, #tpu.memory_space<any>>) target(%119 : memref<1x128xf32, #tpu.memory_space<vmem>>) target_semaphore(%121 : memref<!tpu.dma_semaphore, #tpu.memory_space<semaphore_mem>>)
      %c1_i32_91 = arith.constant 1 : i32
      %122 = arith.addi %113, %c1_i32_91 : i32
      %123 = arith.index_cast %122 : i32 to index
      %124 = memref.load %arg1[%123] : memref<16xi32, #tpu.memory_space<smem>>
      %c1_i32_92 = arith.constant 1 : i32
      %c0_i32_93 = arith.constant 0 : i32
      %125 = tpu.memref_slice %arg2[%124, %c0_i32_93] : memref<64x128xf32, #tpu.memory_space<any>> -> memref<1x128xf32, #tpu.memory_space<any>>
      %c1_i32_94 = arith.constant 1 : i32
      %c0_i32_95 = arith.constant 0 : i32
      %126 = tpu.memref_slice %arg4[%112, %c1_i32_94, %c0_i32_95] : memref<2x16x128xf32, #tpu.memory_space<vmem>> -> memref<1x1x128xf32, #tpu.memory_space<vmem>>
      %127 = tpu.memref_squeeze %126 : memref<1x1x128xf32, #tpu.memory_space<vmem>> -> memref<1x128xf32, #tpu.memory_space<vmem>>
      %128 = tpu.memref_slice %arg5[%112, %c1_i32_92] : memref<2x16x!tpu.dma_semaphore, #tpu.memory_space<semaphore_mem>> -> memref<1x1x!tpu.dma_semaphore, #tpu.memory_space<semaphore_mem>>
      %129 = tpu.memref_squeeze %128 : memref<1x1x!tpu.dma_semaphore, #tpu.memory_space<semaphore_mem>> -> memref<!tpu.dma_semaphore, #tpu.memory_space<semaphore_mem>>
      tpu.enqueue_dma source(%125 : memref<1x128xf32, #tpu.memory_space<any>>) target(%127 : memref<1x128xf32, #tpu.memory_space<vmem>>) target_semaphore(%129 : memref<!tpu.dma_semaphore, #tpu.memory_space<semaphore_mem>>)
      %c2_i32_96 = arith.constant 2 : i32
      %130 = arith.addi %113, %c2_i32_96 : i32
      %131 = arith.index_cast %130 : i32 to index
      %132 = memref.load %arg1[%131] : memref<16xi32, #tpu.memory_space<smem>>
      %c2_i32_97 = arith.constant 2 : i32
      %c0_i32_98 = arith.constant 0 : i32
      %133 = tpu.memref_slice %arg2[%132, %c0_i32_98] : memref<64x128xf32, #tpu.memory_space<any>> -> memref<1x128xf32, #tpu.memory_space<any>>
      %c2_i32_99 = arith.constant 2 : i32
      %c0_i32_100 = arith.constant 0 : i32
      %134 = tpu.memref_slice %arg4[%112, %c2_i32_99, %c0_i32_100] : memref<2x16x128xf32, #tpu.memory_space<vmem>> -> memref<1x1x128xf32, #tpu.memory_space<vmem>>
      %135 = tpu.memref_squeeze %134 : memref<1x1x128xf32, #tpu.memory_space<vmem>> -> memref<1x128xf32, #tpu.memory_space<vmem>>
      %136 = tpu.memref_slice %arg5[%112, %c2_i32_97] : memref<2x16x!tpu.dma_semaphore, #tpu.memory_space<semaphore_mem>> -> memref<1x1x!tpu.dma_semaphore, #tpu.memory_space<semaphore_mem>>
      %137 = tpu.memref_squeeze %136 : memref<1x1x!tpu.dma_semaphore, #tpu.memory_space<semaphore_mem>> -> memref<!tpu.dma_semaphore, #tpu.memory_space<semaphore_mem>>
      tpu.enqueue_dma source(%133 : memref<1x128xf32, #tpu.memory_space<any>>) target(%135 : memref<1x128xf32, #tpu.memory_space<vmem>>) target_semaphore(%137 : memref<!tpu.dma_semaphore, #tpu.memory_space<semaphore_mem>>)
      %c3_i32_101 = arith.constant 3 : i32
      %138 = arith.addi %113, %c3_i32_101 : i32
      %139 = arith.index_cast %138 : i32 to index
      %140 = memref.load %arg1[%139] : memref<16xi32, #tpu.memory_space<smem>>
      %c3_i32_102 = arith.constant 3 : i32
      %c0_i32_103 = arith.constant 0 : i32
      %141 = tpu.memref_slice %arg2[%140, %c0_i32_103] : memref<64x128xf32, #tpu.memory_space<any>> -> memref<1x128xf32, #tpu.memory_space<any>>
      %c3_i32_104 = arith.constant 3 : i32
      %c0_i32_105 = arith.constant 0 : i32
      %142 = tpu.memref_slice %arg4[%112, %c3_i32_104, %c0_i32_105] : memref<2x16x128xf32, #tpu.memory_space<vmem>> -> memref<1x1x128xf32, #tpu.memory_space<vmem>>
      %143 = tpu.memref_squeeze %142 : memref<1x1x128xf32, #tpu.memory_space<vmem>> -> memref<1x128xf32, #tpu.memory_space<vmem>>
      %144 = tpu.memref_slice %arg5[%112, %c3_i32_102] : memref<2x16x!tpu.dma_semaphore, #tpu.memory_space<semaphore_mem>> -> memref<1x1x!tpu.dma_semaphore, #tpu.memory_space<semaphore_mem>>
      %145 = tpu.memref_squeeze %144 : memref<1x1x!tpu.dma_semaphore, #tpu.memory_space<semaphore_mem>> -> memref<!tpu.dma_semaphore, #tpu.memory_space<semaphore_mem>>
      tpu.enqueue_dma source(%141 : memref<1x128xf32, #tpu.memory_space<any>>) target(%143 : memref<1x128xf32, #tpu.memory_space<vmem>>) target_semaphore(%145 : memref<!tpu.dma_semaphore, #tpu.memory_space<semaphore_mem>>)
      %c4_i32_106 = arith.constant 4 : i32
      %146 = arith.addi %113, %c4_i32_106 : i32
      %147 = arith.index_cast %146 : i32 to index
      %148 = memref.load %arg1[%147] : memref<16xi32, #tpu.memory_space<smem>>
      %c4_i32_107 = arith.constant 4 : i32
      %c0_i32_108 = arith.constant 0 : i32
      %149 = tpu.memref_slice %arg2[%148, %c0_i32_108] : memref<64x128xf32, #tpu.memory_space<any>> -> memref<1x128xf32, #tpu.memory_space<any>>
      %c4_i32_109 = arith.constant 4 : i32
      %c0_i32_110 = arith.constant 0 : i32
      %150 = tpu.memref_slice %arg4[%112, %c4_i32_109, %c0_i32_110] : memref<2x16x128xf32, #tpu.memory_space<vmem>> -> memref<1x1x128xf32, #tpu.memory_space<vmem>>
      %151 = tpu.memref_squeeze %150 : memref<1x1x128xf32, #tpu.memory_space<vmem>> -> memref<1x128xf32, #tpu.memory_space<vmem>>
      %152 = tpu.memref_slice %arg5[%112, %c4_i32_107] : memref<2x16x!tpu.dma_semaphore, #tpu.memory_space<semaphore_mem>> -> memref<1x1x!tpu.dma_semaphore, #tpu.memory_space<semaphore_mem>>
      %153 = tpu.memref_squeeze %152 : memref<1x1x!tpu.dma_semaphore, #tpu.memory_space<semaphore_mem>> -> memref<!tpu.dma_semaphore, #tpu.memory_space<semaphore_mem>>
      tpu.enqueue_dma source(%149 : memref<1x128xf32, #tpu.memory_space<any>>) target(%151 : memref<1x128xf32, #tpu.memory_space<vmem>>) target_semaphore(%153 : memref<!tpu.dma_semaphore, #tpu.memory_space<semaphore_mem>>)
      %c5_i32_111 = arith.constant 5 : i32
      %154 = arith.addi %113, %c5_i32_111 : i32
      %155 = arith.index_cast %154 : i32 to index
      %156 = memref.load %arg1[%155] : memref<16xi32, #tpu.memory_space<smem>>
      %c5_i32_112 = arith.constant 5 : i32
      %c0_i32_113 = arith.constant 0 : i32
      %157 = tpu.memref_slice %arg2[%156, %c0_i32_113] : memref<64x128xf32, #tpu.memory_space<any>> -> memref<1x128xf32, #tpu.memory_space<any>>
      %c5_i32_114 = arith.constant 5 : i32
      %c0_i32_115 = arith.constant 0 : i32
      %158 = tpu.memref_slice %arg4[%112, %c5_i32_114, %c0_i32_115] : memref<2x16x128xf32, #tpu.memory_space<vmem>> -> memref<1x1x128xf32, #tpu.memory_space<vmem>>
      %159 = tpu.memref_squeeze %158 : memref<1x1x128xf32, #tpu.memory_space<vmem>> -> memref<1x128xf32, #tpu.memory_space<vmem>>
      %160 = tpu.memref_slice %arg5[%112, %c5_i32_112] : memref<2x16x!tpu.dma_semaphore, #tpu.memory_space<semaphore_mem>> -> memref<1x1x!tpu.dma_semaphore, #tpu.memory_space<semaphore_mem>>
      %161 = tpu.memref_squeeze %160 : memref<1x1x!tpu.dma_semaphore, #tpu.memory_space<semaphore_mem>> -> memref<!tpu.dma_semaphore, #tpu.memory_space<semaphore_mem>>
      tpu.enqueue_dma source(%157 : memref<1x128xf32, #tpu.memory_space<any>>) target(%159 : memref<1x128xf32, #tpu.memory_space<vmem>>) target_semaphore(%161 : memref<!tpu.dma_semaphore, #tpu.memory_space<semaphore_mem>>)
      %c6_i32_116 = arith.constant 6 : i32
      %162 = arith.addi %113, %c6_i32_116 : i32
      %163 = arith.index_cast %162 : i32 to index
      %164 = memref.load %arg1[%163] : memref<16xi32, #tpu.memory_space<smem>>
      %c6_i32_117 = arith.constant 6 : i32
      %c0_i32_118 = arith.constant 0 : i32
      %165 = tpu.memref_slice %arg2[%164, %c0_i32_118] : memref<64x128xf32, #tpu.memory_space<any>> -> memref<1x128xf32, #tpu.memory_space<any>>
      %c6_i32_119 = arith.constant 6 : i32
      %c0_i32_120 = arith.constant 0 : i32
      %166 = tpu.memref_slice %arg4[%112, %c6_i32_119, %c0_i32_120] : memref<2x16x128xf32, #tpu.memory_space<vmem>> -> memref<1x1x128xf32, #tpu.memory_space<vmem>>
      %167 = tpu.memref_squeeze %166 : memref<1x1x128xf32, #tpu.memory_space<vmem>> -> memref<1x128xf32, #tpu.memory_space<vmem>>
      %168 = tpu.memref_slice %arg5[%112, %c6_i32_117] : memref<2x16x!tpu.dma_semaphore, #tpu.memory_space<semaphore_mem>> -> memref<1x1x!tpu.dma_semaphore, #tpu.memory_space<semaphore_mem>>
      %169 = tpu.memref_squeeze %168 : memref<1x1x!tpu.dma_semaphore, #tpu.memory_space<semaphore_mem>> -> memref<!tpu.dma_semaphore, #tpu.memory_space<semaphore_mem>>
      tpu.enqueue_dma source(%165 : memref<1x128xf32, #tpu.memory_space<any>>) target(%167 : memref<1x128xf32, #tpu.memory_space<vmem>>) target_semaphore(%169 : memref<!tpu.dma_semaphore, #tpu.memory_space<semaphore_mem>>)
      %c7_i32_121 = arith.constant 7 : i32
      %170 = arith.addi %113, %c7_i32_121 : i32
      %171 = arith.index_cast %170 : i32 to index
      %172 = memref.load %arg1[%171] : memref<16xi32, #tpu.memory_space<smem>>
      %c7_i32_122 = arith.constant 7 : i32
      %c0_i32_123 = arith.constant 0 : i32
      %173 = tpu.memref_slice %arg2[%172, %c0_i32_123] : memref<64x128xf32, #tpu.memory_space<any>> -> memref<1x128xf32, #tpu.memory_space<any>>
      %c7_i32_124 = arith.constant 7 : i32
      %c0_i32_125 = arith.constant 0 : i32
      %174 = tpu.memref_slice %arg4[%112, %c7_i32_124, %c0_i32_125] : memref<2x16x128xf32, #tpu.memory_space<vmem>> -> memref<1x1x128xf32, #tpu.memory_space<vmem>>
      %175 = tpu.memref_squeeze %174 : memref<1x1x128xf32, #tpu.memory_space<vmem>> -> memref<1x128xf32, #tpu.memory_space<vmem>>
      %176 = tpu.memref_slice %arg5[%112, %c7_i32_122] : memref<2x16x!tpu.dma_semaphore, #tpu.memory_space<semaphore_mem>> -> memref<1x1x!tpu.dma_semaphore, #tpu.memory_space<semaphore_mem>>
      %177 = tpu.memref_squeeze %176 : memref<1x1x!tpu.dma_semaphore, #tpu.memory_space<semaphore_mem>> -> memref<!tpu.dma_semaphore, #tpu.memory_space<semaphore_mem>>
      tpu.enqueue_dma source(%173 : memref<1x128xf32, #tpu.memory_space<any>>) target(%175 : memref<1x128xf32, #tpu.memory_space<vmem>>) target_semaphore(%177 : memref<!tpu.dma_semaphore, #tpu.memory_space<semaphore_mem>>)
      %c8_i32_126 = arith.constant 8 : i32
      %178 = arith.addi %113, %c8_i32_126 : i32
      %179 = arith.index_cast %178 : i32 to index
      %180 = memref.load %arg1[%179] : memref<16xi32, #tpu.memory_space<smem>>
      %c8_i32_127 = arith.constant 8 : i32
      %c0_i32_128 = arith.constant 0 : i32
      %181 = tpu.memref_slice %arg2[%180, %c0_i32_128] : memref<64x128xf32, #tpu.memory_space<any>> -> memref<1x128xf32, #tpu.memory_space<any>>
      %c8_i32_129 = arith.constant 8 : i32
      %c0_i32_130 = arith.constant 0 : i32
      %182 = tpu.memref_slice %arg4[%112, %c8_i32_129, %c0_i32_130] : memref<2x16x128xf32, #tpu.memory_space<vmem>> -> memref<1x1x128xf32, #tpu.memory_space<vmem>>
      %183 = tpu.memref_squeeze %182 : memref<1x1x128xf32, #tpu.memory_space<vmem>> -> memref<1x128xf32, #tpu.memory_space<vmem>>
      %184 = tpu.memref_slice %arg5[%112, %c8_i32_127] : memref<2x16x!tpu.dma_semaphore, #tpu.memory_space<semaphore_mem>> -> memref<1x1x!tpu.dma_semaphore, #tpu.memory_space<semaphore_mem>>
      %185 = tpu.memref_squeeze %184 : memref<1x1x!tpu.dma_semaphore, #tpu.memory_space<semaphore_mem>> -> memref<!tpu.dma_semaphore, #tpu.memory_space<semaphore_mem>>
      tpu.enqueue_dma source(%181 : memref<1x128xf32, #tpu.memory_space<any>>) target(%183 : memref<1x128xf32, #tpu.memory_space<vmem>>) target_semaphore(%185 : memref<!tpu.dma_semaphore, #tpu.memory_space<semaphore_mem>>)
      %c9_i32_131 = arith.constant 9 : i32
      %186 = arith.addi %113, %c9_i32_131 : i32
      %187 = arith.index_cast %186 : i32 to index
      %188 = memref.load %arg1[%187] : memref<16xi32, #tpu.memory_space<smem>>
      %c9_i32_132 = arith.constant 9 : i32
      %c0_i32_133 = arith.constant 0 : i32
      %189 = tpu.memref_slice %arg2[%188, %c0_i32_133] : memref<64x128xf32, #tpu.memory_space<any>> -> memref<1x128xf32, #tpu.memory_space<any>>
      %c9_i32_134 = arith.constant 9 : i32
      %c0_i32_135 = arith.constant 0 : i32
      %190 = tpu.memref_slice %arg4[%112, %c9_i32_134, %c0_i32_135] : memref<2x16x128xf32, #tpu.memory_space<vmem>> -> memref<1x1x128xf32, #tpu.memory_space<vmem>>
      %191 = tpu.memref_squeeze %190 : memref<1x1x128xf32, #tpu.memory_space<vmem>> -> memref<1x128xf32, #tpu.memory_space<vmem>>
      %192 = tpu.memref_slice %arg5[%112, %c9_i32_132] : memref<2x16x!tpu.dma_semaphore, #tpu.memory_space<semaphore_mem>> -> memref<1x1x!tpu.dma_semaphore, #tpu.memory_space<semaphore_mem>>
      %193 = tpu.memref_squeeze %192 : memref<1x1x!tpu.dma_semaphore, #tpu.memory_space<semaphore_mem>> -> memref<!tpu.dma_semaphore, #tpu.memory_space<semaphore_mem>>
      tpu.enqueue_dma source(%189 : memref<1x128xf32, #tpu.memory_space<any>>) target(%191 : memref<1x128xf32, #tpu.memory_space<vmem>>) target_semaphore(%193 : memref<!tpu.dma_semaphore, #tpu.memory_space<semaphore_mem>>)
      %c10_i32_136 = arith.constant 10 : i32
      %194 = arith.addi %113, %c10_i32_136 : i32
      %195 = arith.index_cast %194 : i32 to index
      %196 = memref.load %arg1[%195] : memref<16xi32, #tpu.memory_space<smem>>
      %c10_i32_137 = arith.constant 10 : i32
      %c0_i32_138 = arith.constant 0 : i32
      %197 = tpu.memref_slice %arg2[%196, %c0_i32_138] : memref<64x128xf32, #tpu.memory_space<any>> -> memref<1x128xf32, #tpu.memory_space<any>>
      %c10_i32_139 = arith.constant 10 : i32
      %c0_i32_140 = arith.constant 0 : i32
      %198 = tpu.memref_slice %arg4[%112, %c10_i32_139, %c0_i32_140] : memref<2x16x128xf32, #tpu.memory_space<vmem>> -> memref<1x1x128xf32, #tpu.memory_space<vmem>>
      %199 = tpu.memref_squeeze %198 : memref<1x1x128xf32, #tpu.memory_space<vmem>> -> memref<1x128xf32, #tpu.memory_space<vmem>>
      %200 = tpu.memref_slice %arg5[%112, %c10_i32_137] : memref<2x16x!tpu.dma_semaphore, #tpu.memory_space<semaphore_mem>> -> memref<1x1x!tpu.dma_semaphore, #tpu.memory_space<semaphore_mem>>
      %201 = tpu.memref_squeeze %200 : memref<1x1x!tpu.dma_semaphore, #tpu.memory_space<semaphore_mem>> -> memref<!tpu.dma_semaphore, #tpu.memory_space<semaphore_mem>>
      tpu.enqueue_dma source(%197 : memref<1x128xf32, #tpu.memory_space<any>>) target(%199 : memref<1x128xf32, #tpu.memory_space<vmem>>) target_semaphore(%201 : memref<!tpu.dma_semaphore, #tpu.memory_space<semaphore_mem>>)
      %c11_i32_141 = arith.constant 11 : i32
      %202 = arith.addi %113, %c11_i32_141 : i32
      %203 = arith.index_cast %202 : i32 to index
      %204 = memref.load %arg1[%203] : memref<16xi32, #tpu.memory_space<smem>>
      %c11_i32_142 = arith.constant 11 : i32
      %c0_i32_143 = arith.constant 0 : i32
      %205 = tpu.memref_slice %arg2[%204, %c0_i32_143] : memref<64x128xf32, #tpu.memory_space<any>> -> memref<1x128xf32, #tpu.memory_space<any>>
      %c11_i32_144 = arith.constant 11 : i32
      %c0_i32_145 = arith.constant 0 : i32
      %206 = tpu.memref_slice %arg4[%112, %c11_i32_144, %c0_i32_145] : memref<2x16x128xf32, #tpu.memory_space<vmem>> -> memref<1x1x128xf32, #tpu.memory_space<vmem>>
      %207 = tpu.memref_squeeze %206 : memref<1x1x128xf32, #tpu.memory_space<vmem>> -> memref<1x128xf32, #tpu.memory_space<vmem>>
      %208 = tpu.memref_slice %arg5[%112, %c11_i32_142] : memref<2x16x!tpu.dma_semaphore, #tpu.memory_space<semaphore_mem>> -> memref<1x1x!tpu.dma_semaphore, #tpu.memory_space<semaphore_mem>>
      %209 = tpu.memref_squeeze %208 : memref<1x1x!tpu.dma_semaphore, #tpu.memory_space<semaphore_mem>> -> memref<!tpu.dma_semaphore, #tpu.memory_space<semaphore_mem>>
      tpu.enqueue_dma source(%205 : memref<1x128xf32, #tpu.memory_space<any>>) target(%207 : memref<1x128xf32, #tpu.memory_space<vmem>>) target_semaphore(%209 : memref<!tpu.dma_semaphore, #tpu.memory_space<semaphore_mem>>)
      %c12_i32_146 = arith.constant 12 : i32
      %210 = arith.addi %113, %c12_i32_146 : i32
      %211 = arith.index_cast %210 : i32 to index
      %212 = memref.load %arg1[%211] : memref<16xi32, #tpu.memory_space<smem>>
      %c12_i32_147 = arith.constant 12 : i32
      %c0_i32_148 = arith.constant 0 : i32
      %213 = tpu.memref_slice %arg2[%212, %c0_i32_148] : memref<64x128xf32, #tpu.memory_space<any>> -> memref<1x128xf32, #tpu.memory_space<any>>
      %c12_i32_149 = arith.constant 12 : i32
      %c0_i32_150 = arith.constant 0 : i32
      %214 = tpu.memref_slice %arg4[%112, %c12_i32_149, %c0_i32_150] : memref<2x16x128xf32, #tpu.memory_space<vmem>> -> memref<1x1x128xf32, #tpu.memory_space<vmem>>
      %215 = tpu.memref_squeeze %214 : memref<1x1x128xf32, #tpu.memory_space<vmem>> -> memref<1x128xf32, #tpu.memory_space<vmem>>
      %216 = tpu.memref_slice %arg5[%112, %c12_i32_147] : memref<2x16x!tpu.dma_semaphore, #tpu.memory_space<semaphore_mem>> -> memref<1x1x!tpu.dma_semaphore, #tpu.memory_space<semaphore_mem>>
      %217 = tpu.memref_squeeze %216 : memref<1x1x!tpu.dma_semaphore, #tpu.memory_space<semaphore_mem>> -> memref<!tpu.dma_semaphore, #tpu.memory_space<semaphore_mem>>
      tpu.enqueue_dma source(%213 : memref<1x128xf32, #tpu.memory_space<any>>) target(%215 : memref<1x128xf32, #tpu.memory_space<vmem>>) target_semaphore(%217 : memref<!tpu.dma_semaphore, #tpu.memory_space<semaphore_mem>>)
      %c13_i32_151 = arith.constant 13 : i32
      %218 = arith.addi %113, %c13_i32_151 : i32
      %219 = arith.index_cast %218 : i32 to index
      %220 = memref.load %arg1[%219] : memref<16xi32, #tpu.memory_space<smem>>
      %c13_i32_152 = arith.constant 13 : i32
      %c0_i32_153 = arith.constant 0 : i32
      %221 = tpu.memref_slice %arg2[%220, %c0_i32_153] : memref<64x128xf32, #tpu.memory_space<any>> -> memref<1x128xf32, #tpu.memory_space<any>>
      %c13_i32_154 = arith.constant 13 : i32
      %c0_i32_155 = arith.constant 0 : i32
      %222 = tpu.memref_slice %arg4[%112, %c13_i32_154, %c0_i32_155] : memref<2x16x128xf32, #tpu.memory_space<vmem>> -> memref<1x1x128xf32, #tpu.memory_space<vmem>>
      %223 = tpu.memref_squeeze %222 : memref<1x1x128xf32, #tpu.memory_space<vmem>> -> memref<1x128xf32, #tpu.memory_space<vmem>>
      %224 = tpu.memref_slice %arg5[%112, %c13_i32_152] : memref<2x16x!tpu.dma_semaphore, #tpu.memory_space<semaphore_mem>> -> memref<1x1x!tpu.dma_semaphore, #tpu.memory_space<semaphore_mem>>
      %225 = tpu.memref_squeeze %224 : memref<1x1x!tpu.dma_semaphore, #tpu.memory_space<semaphore_mem>> -> memref<!tpu.dma_semaphore, #tpu.memory_space<semaphore_mem>>
      tpu.enqueue_dma source(%221 : memref<1x128xf32, #tpu.memory_space<any>>) target(%223 : memref<1x128xf32, #tpu.memory_space<vmem>>) target_semaphore(%225 : memref<!tpu.dma_semaphore, #tpu.memory_space<semaphore_mem>>)
      %c14_i32_156 = arith.constant 14 : i32
      %226 = arith.addi %113, %c14_i32_156 : i32
      %227 = arith.index_cast %226 : i32 to index
      %228 = memref.load %arg1[%227] : memref<16xi32, #tpu.memory_space<smem>>
      %c14_i32_157 = arith.constant 14 : i32
      %c0_i32_158 = arith.constant 0 : i32
      %229 = tpu.memref_slice %arg2[%228, %c0_i32_158] : memref<64x128xf32, #tpu.memory_space<any>> -> memref<1x128xf32, #tpu.memory_space<any>>
      %c14_i32_159 = arith.constant 14 : i32
      %c0_i32_160 = arith.constant 0 : i32
      %230 = tpu.memref_slice %arg4[%112, %c14_i32_159, %c0_i32_160] : memref<2x16x128xf32, #tpu.memory_space<vmem>> -> memref<1x1x128xf32, #tpu.memory_space<vmem>>
      %231 = tpu.memref_squeeze %230 : memref<1x1x128xf32, #tpu.memory_space<vmem>> -> memref<1x128xf32, #tpu.memory_space<vmem>>
      %232 = tpu.memref_slice %arg5[%112, %c14_i32_157] : memref<2x16x!tpu.dma_semaphore, #tpu.memory_space<semaphore_mem>> -> memref<1x1x!tpu.dma_semaphore, #tpu.memory_space<semaphore_mem>>
      %233 = tpu.memref_squeeze %232 : memref<1x1x!tpu.dma_semaphore, #tpu.memory_space<semaphore_mem>> -> memref<!tpu.dma_semaphore, #tpu.memory_space<semaphore_mem>>
      tpu.enqueue_dma source(%229 : memref<1x128xf32, #tpu.memory_space<any>>) target(%231 : memref<1x128xf32, #tpu.memory_space<vmem>>) target_semaphore(%233 : memref<!tpu.dma_semaphore, #tpu.memory_space<semaphore_mem>>)
      %c15_i32_161 = arith.constant 15 : i32
      %234 = arith.addi %113, %c15_i32_161 : i32
      %235 = arith.index_cast %234 : i32 to index
      %236 = memref.load %arg1[%235] : memref<16xi32, #tpu.memory_space<smem>>
      %c15_i32_162 = arith.constant 15 : i32
      %c0_i32_163 = arith.constant 0 : i32
      %237 = tpu.memref_slice %arg2[%236, %c0_i32_163] : memref<64x128xf32, #tpu.memory_space<any>> -> memref<1x128xf32, #tpu.memory_space<any>>
      %c15_i32_164 = arith.constant 15 : i32
      %c0_i32_165 = arith.constant 0 : i32
      %238 = tpu.memref_slice %arg4[%112, %c15_i32_164, %c0_i32_165] : memref<2x16x128xf32, #tpu.memory_space<vmem>> -> memref<1x1x128xf32, #tpu.memory_space<vmem>>
      %239 = tpu.memref_squeeze %238 : memref<1x1x128xf32, #tpu.memory_space<vmem>> -> memref<1x128xf32, #tpu.memory_space<vmem>>
      %240 = tpu.memref_slice %arg5[%112, %c15_i32_162] : memref<2x16x!tpu.dma_semaphore, #tpu.memory_space<semaphore_mem>> -> memref<1x1x!tpu.dma_semaphore, #tpu.memory_space<semaphore_mem>>
      %241 = tpu.memref_squeeze %240 : memref<1x1x!tpu.dma_semaphore, #tpu.memory_space<semaphore_mem>> -> memref<!tpu.dma_semaphore, #tpu.memory_space<semaphore_mem>>
      tpu.enqueue_dma source(%237 : memref<1x128xf32, #tpu.memory_space<any>>) target(%239 : memref<1x128xf32, #tpu.memory_space<vmem>>) target_semaphore(%241 : memref<!tpu.dma_semaphore, #tpu.memory_space<semaphore_mem>>)
    } else {
    }
    %c2_i32 = arith.constant 2 : i32
    %c0_i32_3 = arith.constant 0 : i32
    %7 = arith.cmpi eq, %c2_i32, %c0_i32_3 : i32
    %c1_i32_4 = arith.constant 1 : i32
    %8 = arith.select %7, %c1_i32_4, %c2_i32 : i32
    %9 = arith.remsi %arg0, %8 : i32
    %c0_i32_5 = arith.constant 0 : i32
    %10 = arith.cmpi ne, %9, %c0_i32_5 : i32
    %c0_i32_6 = arith.constant 0 : i32
    %11 = arith.cmpi slt, %9, %c0_i32_6 : i32
    %c0_i32_7 = arith.constant 0 : i32
    %12 = arith.cmpi slt, %8, %c0_i32_7 : i32
    %13 = arith.xori %11, %12 : i1
    %14 = arith.andi %13, %10 : i1
    %15 = arith.addi %9, %8 : i32
    %16 = arith.select %14, %15, %9 : i32
    %c0_i32_8 = arith.constant 0 : i32
    %c0_i32_9 = arith.constant 0 : i32
    %c0_i32_10 = arith.constant 0 : i32
    %17 = tpu.memref_slice %arg2[%c0_i32_9, %c0_i32_10] : memref<64x128xf32, #tpu.memory_space<any>> -> memref<1x128xf32, #tpu.memory_space<any>>
    %c0_i32_11 = arith.constant 0 : i32
    %c0_i32_12 = arith.constant 0 : i32
    %18 = tpu.memref_slice %arg4[%16, %c0_i32_11, %c0_i32_12] : memref<2x16x128xf32, #tpu.memory_space<vmem>> -> memref<1x1x128xf32, #tpu.memory_space<vmem>>
    %19 = tpu.memref_squeeze %18 : memref<1x1x128xf32, #tpu.memory_space<vmem>> -> memref<1x128xf32, #tpu.memory_space<vmem>>
    %20 = tpu.memref_slice %arg5[%16, %c0_i32_8] : memref<2x16x!tpu.dma_semaphore, #tpu.memory_space<semaphore_mem>> -> memref<1x1x!tpu.dma_semaphore, #tpu.memory_space<semaphore_mem>>
    %21 = tpu.memref_squeeze %20 : memref<1x1x!tpu.dma_semaphore, #tpu.memory_space<semaphore_mem>> -> memref<!tpu.dma_semaphore, #tpu.memory_space<semaphore_mem>>
    tpu.wait_dma2 semaphore(%21 : memref<!tpu.dma_semaphore, #tpu.memory_space<semaphore_mem>>) src(%17 : memref<1x128xf32, #tpu.memory_space<any>>) dst(%19 : memref<1x128xf32, #tpu.memory_space<vmem>>)
    %c1_i32_13 = arith.constant 1 : i32
    %c0_i32_14 = arith.constant 0 : i32
    %c0_i32_15 = arith.constant 0 : i32
    %22 = tpu.memref_slice %arg2[%c0_i32_14, %c0_i32_15] : memref<64x128xf32, #tpu.memory_space<any>> -> memref<1x128xf32, #tpu.memory_space<any>>
    %c1_i32_16 = arith.constant 1 : i32
    %c0_i32_17 = arith.constant 0 : i32
    %23 = tpu.memref_slice %arg4[%16, %c1_i32_16, %c0_i32_17] : memref<2x16x128xf32, #tpu.memory_space<vmem>> -> memref<1x1x128xf32, #tpu.memory_space<vmem>>
    %24 = tpu.memref_squeeze %23 : memref<1x1x128xf32, #tpu.memory_space<vmem>> -> memref<1x128xf32, #tpu.memory_space<vmem>>
    %25 = tpu.memref_slice %arg5[%16, %c1_i32_13] : memref<2x16x!tpu.dma_semaphore, #tpu.memory_space<semaphore_mem>> -> memref<1x1x!tpu.dma_semaphore, #tpu.memory_space<semaphore_mem>>
    %26 = tpu.memref_squeeze %25 : memref<1x1x!tpu.dma_semaphore, #tpu.memory_space<semaphore_mem>> -> memref<!tpu.dma_semaphore, #tpu.memory_space<semaphore_mem>>
    tpu.wait_dma2 semaphore(%26 : memref<!tpu.dma_semaphore, #tpu.memory_space<semaphore_mem>>) src(%22 : memref<1x128xf32, #tpu.memory_space<any>>) dst(%24 : memref<1x128xf32, #tpu.memory_space<vmem>>)
    %c2_i32_18 = arith.constant 2 : i32
    %c0_i32_19 = arith.constant 0 : i32
    %c0_i32_20 = arith.constant 0 : i32
    %27 = tpu.memref_slice %arg2[%c0_i32_19, %c0_i32_20] : memref<64x128xf32, #tpu.memory_space<any>> -> memref<1x128xf32, #tpu.memory_space<any>>
    %c2_i32_21 = arith.constant 2 : i32
    %c0_i32_22 = arith.constant 0 : i32
    %28 = tpu.memref_slice %arg4[%16, %c2_i32_21, %c0_i32_22] : memref<2x16x128xf32, #tpu.memory_space<vmem>> -> memref<1x1x128xf32, #tpu.memory_space<vmem>>
    %29 = tpu.memref_squeeze %28 : memref<1x1x128xf32, #tpu.memory_space<vmem>> -> memref<1x128xf32, #tpu.memory_space<vmem>>
    %30 = tpu.memref_slice %arg5[%16, %c2_i32_18] : memref<2x16x!tpu.dma_semaphore, #tpu.memory_space<semaphore_mem>> -> memref<1x1x!tpu.dma_semaphore, #tpu.memory_space<semaphore_mem>>
    %31 = tpu.memref_squeeze %30 : memref<1x1x!tpu.dma_semaphore, #tpu.memory_space<semaphore_mem>> -> memref<!tpu.dma_semaphore, #tpu.memory_space<semaphore_mem>>
    tpu.wait_dma2 semaphore(%31 : memref<!tpu.dma_semaphore, #tpu.memory_space<semaphore_mem>>) src(%27 : memref<1x128xf32, #tpu.memory_space<any>>) dst(%29 : memref<1x128xf32, #tpu.memory_space<vmem>>)
    %c3_i32 = arith.constant 3 : i32
    %c0_i32_23 = arith.constant 0 : i32
    %c0_i32_24 = arith.constant 0 : i32
    %32 = tpu.memref_slice %arg2[%c0_i32_23, %c0_i32_24] : memref<64x128xf32, #tpu.memory_space<any>> -> memref<1x128xf32, #tpu.memory_space<any>>
    %c3_i32_25 = arith.constant 3 : i32
    %c0_i32_26 = arith.constant 0 : i32
    %33 = tpu.memref_slice %arg4[%16, %c3_i32_25, %c0_i32_26] : memref<2x16x128xf32, #tpu.memory_space<vmem>> -> memref<1x1x128xf32, #tpu.memory_space<vmem>>
    %34 = tpu.memref_squeeze %33 : memref<1x1x128xf32, #tpu.memory_space<vmem>> -> memref<1x128xf32, #tpu.memory_space<vmem>>
    %35 = tpu.memref_slice %arg5[%16, %c3_i32] : memref<2x16x!tpu.dma_semaphore, #tpu.memory_space<semaphore_mem>> -> memref<1x1x!tpu.dma_semaphore, #tpu.memory_space<semaphore_mem>>
    %36 = tpu.memref_squeeze %35 : memref<1x1x!tpu.dma_semaphore, #tpu.memory_space<semaphore_mem>> -> memref<!tpu.dma_semaphore, #tpu.memory_space<semaphore_mem>>
    tpu.wait_dma2 semaphore(%36 : memref<!tpu.dma_semaphore, #tpu.memory_space<semaphore_mem>>) src(%32 : memref<1x128xf32, #tpu.memory_space<any>>) dst(%34 : memref<1x128xf32, #tpu.memory_space<vmem>>)
    %c4_i32 = arith.constant 4 : i32
    %c0_i32_27 = arith.constant 0 : i32
    %c0_i32_28 = arith.constant 0 : i32
    %37 = tpu.memref_slice %arg2[%c0_i32_27, %c0_i32_28] : memref<64x128xf32, #tpu.memory_space<any>> -> memref<1x128xf32, #tpu.memory_space<any>>
    %c4_i32_29 = arith.constant 4 : i32
    %c0_i32_30 = arith.constant 0 : i32
    %38 = tpu.memref_slice %arg4[%16, %c4_i32_29, %c0_i32_30] : memref<2x16x128xf32, #tpu.memory_space<vmem>> -> memref<1x1x128xf32, #tpu.memory_space<vmem>>
    %39 = tpu.memref_squeeze %38 : memref<1x1x128xf32, #tpu.memory_space<vmem>> -> memref<1x128xf32, #tpu.memory_space<vmem>>
    %40 = tpu.memref_slice %arg5[%16, %c4_i32] : memref<2x16x!tpu.dma_semaphore, #tpu.memory_space<semaphore_mem>> -> memref<1x1x!tpu.dma_semaphore, #tpu.memory_space<semaphore_mem>>
    %41 = tpu.memref_squeeze %40 : memref<1x1x!tpu.dma_semaphore, #tpu.memory_space<semaphore_mem>> -> memref<!tpu.dma_semaphore, #tpu.memory_space<semaphore_mem>>
    tpu.wait_dma2 semaphore(%41 : memref<!tpu.dma_semaphore, #tpu.memory_space<semaphore_mem>>) src(%37 : memref<1x128xf32, #tpu.memory_space<any>>) dst(%39 : memref<1x128xf32, #tpu.memory_space<vmem>>)
    %c5_i32 = arith.constant 5 : i32
    %c0_i32_31 = arith.constant 0 : i32
    %c0_i32_32 = arith.constant 0 : i32
    %42 = tpu.memref_slice %arg2[%c0_i32_31, %c0_i32_32] : memref<64x128xf32, #tpu.memory_space<any>> -> memref<1x128xf32, #tpu.memory_space<any>>
    %c5_i32_33 = arith.constant 5 : i32
    %c0_i32_34 = arith.constant 0 : i32
    %43 = tpu.memref_slice %arg4[%16, %c5_i32_33, %c0_i32_34] : memref<2x16x128xf32, #tpu.memory_space<vmem>> -> memref<1x1x128xf32, #tpu.memory_space<vmem>>
    %44 = tpu.memref_squeeze %43 : memref<1x1x128xf32, #tpu.memory_space<vmem>> -> memref<1x128xf32, #tpu.memory_space<vmem>>
    %45 = tpu.memref_slice %arg5[%16, %c5_i32] : memref<2x16x!tpu.dma_semaphore, #tpu.memory_space<semaphore_mem>> -> memref<1x1x!tpu.dma_semaphore, #tpu.memory_space<semaphore_mem>>
    %46 = tpu.memref_squeeze %45 : memref<1x1x!tpu.dma_semaphore, #tpu.memory_space<semaphore_mem>> -> memref<!tpu.dma_semaphore, #tpu.memory_space<semaphore_mem>>
    tpu.wait_dma2 semaphore(%46 : memref<!tpu.dma_semaphore, #tpu.memory_space<semaphore_mem>>) src(%42 : memref<1x128xf32, #tpu.memory_space<any>>) dst(%44 : memref<1x128xf32, #tpu.memory_space<vmem>>)
    %c6_i32 = arith.constant 6 : i32
    %c0_i32_35 = arith.constant 0 : i32
    %c0_i32_36 = arith.constant 0 : i32
    %47 = tpu.memref_slice %arg2[%c0_i32_35, %c0_i32_36] : memref<64x128xf32, #tpu.memory_space<any>> -> memref<1x128xf32, #tpu.memory_space<any>>
    %c6_i32_37 = arith.constant 6 : i32
    %c0_i32_38 = arith.constant 0 : i32
    %48 = tpu.memref_slice %arg4[%16, %c6_i32_37, %c0_i32_38] : memref<2x16x128xf32, #tpu.memory_space<vmem>> -> memref<1x1x128xf32, #tpu.memory_space<vmem>>
    %49 = tpu.memref_squeeze %48 : memref<1x1x128xf32, #tpu.memory_space<vmem>> -> memref<1x128xf32, #tpu.memory_space<vmem>>
    %50 = tpu.memref_slice %arg5[%16, %c6_i32] : memref<2x16x!tpu.dma_semaphore, #tpu.memory_space<semaphore_mem>> -> memref<1x1x!tpu.dma_semaphore, #tpu.memory_space<semaphore_mem>>
    %51 = tpu.memref_squeeze %50 : memref<1x1x!tpu.dma_semaphore, #tpu.memory_space<semaphore_mem>> -> memref<!tpu.dma_semaphore, #tpu.memory_space<semaphore_mem>>
    tpu.wait_dma2 semaphore(%51 : memref<!tpu.dma_semaphore, #tpu.memory_space<semaphore_mem>>) src(%47 : memref<1x128xf32, #tpu.memory_space<any>>) dst(%49 : memref<1x128xf32, #tpu.memory_space<vmem>>)
    %c7_i32 = arith.constant 7 : i32
    %c0_i32_39 = arith.constant 0 : i32
    %c0_i32_40 = arith.constant 0 : i32
    %52 = tpu.memref_slice %arg2[%c0_i32_39, %c0_i32_40] : memref<64x128xf32, #tpu.memory_space<any>> -> memref<1x128xf32, #tpu.memory_space<any>>
    %c7_i32_41 = arith.constant 7 : i32
    %c0_i32_42 = arith.constant 0 : i32
    %53 = tpu.memref_slice %arg4[%16, %c7_i32_41, %c0_i32_42] : memref<2x16x128xf32, #tpu.memory_space<vmem>> -> memref<1x1x128xf32, #tpu.memory_space<vmem>>
    %54 = tpu.memref_squeeze %53 : memref<1x1x128xf32, #tpu.memory_space<vmem>> -> memref<1x128xf32, #tpu.memory_space<vmem>>
    %55 = tpu.memref_slice %arg5[%16, %c7_i32] : memref<2x16x!tpu.dma_semaphore, #tpu.memory_space<semaphore_mem>> -> memref<1x1x!tpu.dma_semaphore, #tpu.memory_space<semaphore_mem>>
    %56 = tpu.memref_squeeze %55 : memref<1x1x!tpu.dma_semaphore, #tpu.memory_space<semaphore_mem>> -> memref<!tpu.dma_semaphore, #tpu.memory_space<semaphore_mem>>
    tpu.wait_dma2 semaphore(%56 : memref<!tpu.dma_semaphore, #tpu.memory_space<semaphore_mem>>) src(%52 : memref<1x128xf32, #tpu.memory_space<any>>) dst(%54 : memref<1x128xf32, #tpu.memory_space<vmem>>)
    %c8_i32 = arith.constant 8 : i32
    %c0_i32_43 = arith.constant 0 : i32
    %c0_i32_44 = arith.constant 0 : i32
    %57 = tpu.memref_slice %arg2[%c0_i32_43, %c0_i32_44] : memref<64x128xf32, #tpu.memory_space<any>> -> memref<1x128xf32, #tpu.memory_space<any>>
    %c8_i32_45 = arith.constant 8 : i32
    %c0_i32_46 = arith.constant 0 : i32
    %58 = tpu.memref_slice %arg4[%16, %c8_i32_45, %c0_i32_46] : memref<2x16x128xf32, #tpu.memory_space<vmem>> -> memref<1x1x128xf32, #tpu.memory_space<vmem>>
    %59 = tpu.memref_squeeze %58 : memref<1x1x128xf32, #tpu.memory_space<vmem>> -> memref<1x128xf32, #tpu.memory_space<vmem>>
    %60 = tpu.memref_slice %arg5[%16, %c8_i32] : memref<2x16x!tpu.dma_semaphore, #tpu.memory_space<semaphore_mem>> -> memref<1x1x!tpu.dma_semaphore, #tpu.memory_space<semaphore_mem>>
    %61 = tpu.memref_squeeze %60 : memref<1x1x!tpu.dma_semaphore, #tpu.memory_space<semaphore_mem>> -> memref<!tpu.dma_semaphore, #tpu.memory_space<semaphore_mem>>
    tpu.wait_dma2 semaphore(%61 : memref<!tpu.dma_semaphore, #tpu.memory_space<semaphore_mem>>) src(%57 : memref<1x128xf32, #tpu.memory_space<any>>) dst(%59 : memref<1x128xf32, #tpu.memory_space<vmem>>)
    %c9_i32 = arith.constant 9 : i32
    %c0_i32_47 = arith.constant 0 : i32
    %c0_i32_48 = arith.constant 0 : i32
    %62 = tpu.memref_slice %arg2[%c0_i32_47, %c0_i32_48] : memref<64x128xf32, #tpu.memory_space<any>> -> memref<1x128xf32, #tpu.memory_space<any>>
    %c9_i32_49 = arith.constant 9 : i32
    %c0_i32_50 = arith.constant 0 : i32
    %63 = tpu.memref_slice %arg4[%16, %c9_i32_49, %c0_i32_50] : memref<2x16x128xf32, #tpu.memory_space<vmem>> -> memref<1x1x128xf32, #tpu.memory_space<vmem>>
    %64 = tpu.memref_squeeze %63 : memref<1x1x128xf32, #tpu.memory_space<vmem>> -> memref<1x128xf32, #tpu.memory_space<vmem>>
    %65 = tpu.memref_slice %arg5[%16, %c9_i32] : memref<2x16x!tpu.dma_semaphore, #tpu.memory_space<semaphore_mem>> -> memref<1x1x!tpu.dma_semaphore, #tpu.memory_space<semaphore_mem>>
    %66 = tpu.memref_squeeze %65 : memref<1x1x!tpu.dma_semaphore, #tpu.memory_space<semaphore_mem>> -> memref<!tpu.dma_semaphore, #tpu.memory_space<semaphore_mem>>
    tpu.wait_dma2 semaphore(%66 : memref<!tpu.dma_semaphore, #tpu.memory_space<semaphore_mem>>) src(%62 : memref<1x128xf32, #tpu.memory_space<any>>) dst(%64 : memref<1x128xf32, #tpu.memory_space<vmem>>)
    %c10_i32 = arith.constant 10 : i32
    %c0_i32_51 = arith.constant 0 : i32
    %c0_i32_52 = arith.constant 0 : i32
    %67 = tpu.memref_slice %arg2[%c0_i32_51, %c0_i32_52] : memref<64x128xf32, #tpu.memory_space<any>> -> memref<1x128xf32, #tpu.memory_space<any>>
    %c10_i32_53 = arith.constant 10 : i32
    %c0_i32_54 = arith.constant 0 : i32
    %68 = tpu.memref_slice %arg4[%16, %c10_i32_53, %c0_i32_54] : memref<2x16x128xf32, #tpu.memory_space<vmem>> -> memref<1x1x128xf32, #tpu.memory_space<vmem>>
    %69 = tpu.memref_squeeze %68 : memref<1x1x128xf32, #tpu.memory_space<vmem>> -> memref<1x128xf32, #tpu.memory_space<vmem>>
    %70 = tpu.memref_slice %arg5[%16, %c10_i32] : memref<2x16x!tpu.dma_semaphore, #tpu.memory_space<semaphore_mem>> -> memref<1x1x!tpu.dma_semaphore, #tpu.memory_space<semaphore_mem>>
    %71 = tpu.memref_squeeze %70 : memref<1x1x!tpu.dma_semaphore, #tpu.memory_space<semaphore_mem>> -> memref<!tpu.dma_semaphore, #tpu.memory_space<semaphore_mem>>
    tpu.wait_dma2 semaphore(%71 : memref<!tpu.dma_semaphore, #tpu.memory_space<semaphore_mem>>) src(%67 : memref<1x128xf32, #tpu.memory_space<any>>) dst(%69 : memref<1x128xf32, #tpu.memory_space<vmem>>)
    %c11_i32 = arith.constant 11 : i32
    %c0_i32_55 = arith.constant 0 : i32
    %c0_i32_56 = arith.constant 0 : i32
    %72 = tpu.memref_slice %arg2[%c0_i32_55, %c0_i32_56] : memref<64x128xf32, #tpu.memory_space<any>> -> memref<1x128xf32, #tpu.memory_space<any>>
    %c11_i32_57 = arith.constant 11 : i32
    %c0_i32_58 = arith.constant 0 : i32
    %73 = tpu.memref_slice %arg4[%16, %c11_i32_57, %c0_i32_58] : memref<2x16x128xf32, #tpu.memory_space<vmem>> -> memref<1x1x128xf32, #tpu.memory_space<vmem>>
    %74 = tpu.memref_squeeze %73 : memref<1x1x128xf32, #tpu.memory_space<vmem>> -> memref<1x128xf32, #tpu.memory_space<vmem>>
    %75 = tpu.memref_slice %arg5[%16, %c11_i32] : memref<2x16x!tpu.dma_semaphore, #tpu.memory_space<semaphore_mem>> -> memref<1x1x!tpu.dma_semaphore, #tpu.memory_space<semaphore_mem>>
    %76 = tpu.memref_squeeze %75 : memref<1x1x!tpu.dma_semaphore, #tpu.memory_space<semaphore_mem>> -> memref<!tpu.dma_semaphore, #tpu.memory_space<semaphore_mem>>
    tpu.wait_dma2 semaphore(%76 : memref<!tpu.dma_semaphore, #tpu.memory_space<semaphore_mem>>) src(%72 : memref<1x128xf32, #tpu.memory_space<any>>) dst(%74 : memref<1x128xf32, #tpu.memory_space<vmem>>)
    %c12_i32 = arith.constant 12 : i32
    %c0_i32_59 = arith.constant 0 : i32
    %c0_i32_60 = arith.constant 0 : i32
    %77 = tpu.memref_slice %arg2[%c0_i32_59, %c0_i32_60] : memref<64x128xf32, #tpu.memory_space<any>> -> memref<1x128xf32, #tpu.memory_space<any>>
    %c12_i32_61 = arith.constant 12 : i32
    %c0_i32_62 = arith.constant 0 : i32
    %78 = tpu.memref_slice %arg4[%16, %c12_i32_61, %c0_i32_62] : memref<2x16x128xf32, #tpu.memory_space<vmem>> -> memref<1x1x128xf32, #tpu.memory_space<vmem>>
    %79 = tpu.memref_squeeze %78 : memref<1x1x128xf32, #tpu.memory_space<vmem>> -> memref<1x128xf32, #tpu.memory_space<vmem>>
    %80 = tpu.memref_slice %arg5[%16, %c12_i32] : memref<2x16x!tpu.dma_semaphore, #tpu.memory_space<semaphore_mem>> -> memref<1x1x!tpu.dma_semaphore, #tpu.memory_space<semaphore_mem>>
    %81 = tpu.memref_squeeze %80 : memref<1x1x!tpu.dma_semaphore, #tpu.memory_space<semaphore_mem>> -> memref<!tpu.dma_semaphore, #tpu.memory_space<semaphore_mem>>
    tpu.wait_dma2 semaphore(%81 : memref<!tpu.dma_semaphore, #tpu.memory_space<semaphore_mem>>) src(%77 : memref<1x128xf32, #tpu.memory_space<any>>) dst(%79 : memref<1x128xf32, #tpu.memory_space<vmem>>)
    %c13_i32 = arith.constant 13 : i32
    %c0_i32_63 = arith.constant 0 : i32
    %c0_i32_64 = arith.constant 0 : i32
    %82 = tpu.memref_slice %arg2[%c0_i32_63, %c0_i32_64] : memref<64x128xf32, #tpu.memory_space<any>> -> memref<1x128xf32, #tpu.memory_space<any>>
    %c13_i32_65 = arith.constant 13 : i32
    %c0_i32_66 = arith.constant 0 : i32
    %83 = tpu.memref_slice %arg4[%16, %c13_i32_65, %c0_i32_66] : memref<2x16x128xf32, #tpu.memory_space<vmem>> -> memref<1x1x128xf32, #tpu.memory_space<vmem>>
    %84 = tpu.memref_squeeze %83 : memref<1x1x128xf32, #tpu.memory_space<vmem>> -> memref<1x128xf32, #tpu.memory_space<vmem>>
    %85 = tpu.memref_slice %arg5[%16, %c13_i32] : memref<2x16x!tpu.dma_semaphore, #tpu.memory_space<semaphore_mem>> -> memref<1x1x!tpu.dma_semaphore, #tpu.memory_space<semaphore_mem>>
    %86 = tpu.memref_squeeze %85 : memref<1x1x!tpu.dma_semaphore, #tpu.memory_space<semaphore_mem>> -> memref<!tpu.dma_semaphore, #tpu.memory_space<semaphore_mem>>
    tpu.wait_dma2 semaphore(%86 : memref<!tpu.dma_semaphore, #tpu.memory_space<semaphore_mem>>) src(%82 : memref<1x128xf32, #tpu.memory_space<any>>) dst(%84 : memref<1x128xf32, #tpu.memory_space<vmem>>)
    %c14_i32 = arith.constant 14 : i32
    %c0_i32_67 = arith.constant 0 : i32
    %c0_i32_68 = arith.constant 0 : i32
    %87 = tpu.memref_slice %arg2[%c0_i32_67, %c0_i32_68] : memref<64x128xf32, #tpu.memory_space<any>> -> memref<1x128xf32, #tpu.memory_space<any>>
    %c14_i32_69 = arith.constant 14 : i32
    %c0_i32_70 = arith.constant 0 : i32
    %88 = tpu.memref_slice %arg4[%16, %c14_i32_69, %c0_i32_70] : memref<2x16x128xf32, #tpu.memory_space<vmem>> -> memref<1x1x128xf32, #tpu.memory_space<vmem>>
    %89 = tpu.memref_squeeze %88 : memref<1x1x128xf32, #tpu.memory_space<vmem>> -> memref<1x128xf32, #tpu.memory_space<vmem>>
    %90 = tpu.memref_slice %arg5[%16, %c14_i32] : memref<2x16x!tpu.dma_semaphore, #tpu.memory_space<semaphore_mem>> -> memref<1x1x!tpu.dma_semaphore, #tpu.memory_space<semaphore_mem>>
    %91 = tpu.memref_squeeze %90 : memref<1x1x!tpu.dma_semaphore, #tpu.memory_space<semaphore_mem>> -> memref<!tpu.dma_semaphore, #tpu.memory_space<semaphore_mem>>
    tpu.wait_dma2 semaphore(%91 : memref<!tpu.dma_semaphore, #tpu.memory_space<semaphore_mem>>) src(%87 : memref<1x128xf32, #tpu.memory_space<any>>) dst(%89 : memref<1x128xf32, #tpu.memory_space<vmem>>)
    %c15_i32 = arith.constant 15 : i32
    %c0_i32_71 = arith.constant 0 : i32
    %c0_i32_72 = arith.constant 0 : i32
    %92 = tpu.memref_slice %arg2[%c0_i32_71, %c0_i32_72] : memref<64x128xf32, #tpu.memory_space<any>> -> memref<1x128xf32, #tpu.memory_space<any>>
    %c15_i32_73 = arith.constant 15 : i32
    %c0_i32_74 = arith.constant 0 : i32
    %93 = tpu.memref_slice %arg4[%16, %c15_i32_73, %c0_i32_74] : memref<2x16x128xf32, #tpu.memory_space<vmem>> -> memref<1x1x128xf32, #tpu.memory_space<vmem>>
    %94 = tpu.memref_squeeze %93 : memref<1x1x128xf32, #tpu.memory_space<vmem>> -> memref<1x128xf32, #tpu.memory_space<vmem>>
    %95 = tpu.memref_slice %arg5[%16, %c15_i32] : memref<2x16x!tpu.dma_semaphore, #tpu.memory_space<semaphore_mem>> -> memref<1x1x!tpu.dma_semaphore, #tpu.memory_space<semaphore_mem>>
    %96 = tpu.memref_squeeze %95 : memref<1x1x!tpu.dma_semaphore, #tpu.memory_space<semaphore_mem>> -> memref<!tpu.dma_semaphore, #tpu.memory_space<semaphore_mem>>
    tpu.wait_dma2 semaphore(%96 : memref<!tpu.dma_semaphore, #tpu.memory_space<semaphore_mem>>) src(%92 : memref<1x128xf32, #tpu.memory_space<any>>) dst(%94 : memref<1x128xf32, #tpu.memory_space<vmem>>)
    %97 = arith.index_cast %16 : i32 to index
    %c0 = arith.constant 0 : index
    %c0_75 = arith.constant 0 : index
    %98 = vector.load %arg4[%97, %c0, %c0_75] : memref<2x16x128xf32, #tpu.memory_space<vmem>>, vector<1x16x128xf32>
    %99 = vector.shape_cast %98 : vector<1x16x128xf32> to vector<16x128xf32>
    %c0_76 = arith.constant 0 : index
    %c0_77 = arith.constant 0 : index
    %100 = vector.load %arg3[%c0_76, %c0_77] : memref<16x128xf32, #tpu.memory_space<vmem>>, vector<16x128xf32>
    tpu.vector_store %arg3[%c0_76, %c0_77], %99 {strides = array<i32>} : memref<16x128xf32, #tpu.memory_space<vmem>>, vector<16x128xf32>,
    return
  }
  func.func @transform_1(%arg0: i32, %arg1: memref<16xi32, #tpu.memory_space<smem>>) -> (i32, i32) {
    %c0_i32 = arith.constant 0 : i32
    %c0_i32_0 = arith.constant 0 : i32
    return %arg0, %c0_i32 : i32, i32
  }
}

</mosaic_0001>

<bundles_post_ra>
// kernel: tpu_custom_call.1
= control target key start
LH: loop header
LB: loop body
LE: loop exit
PB: predicated region body
PF: predicated region fallthrough
CT: control target
= control target key end

     0   :  { %s1630_s9 = smov [#allocation5]   ;;  %s1910_s0 = inlined_call_operand.hbm [shape: s32[16], index: 0, kind: input, shape index: {}]   ;;  %s1911_s1 = inlined_call_operand.hbm [shape: f32[64,128], index: 1, kind: input, shape index: {}]   ;;  %s1912_s2 = inlined_call_operand.hbm [shape: f32[16,128], index: 2, kind: output, shape index: {}]  }
   0x1   :  { %8 = dma.hbm_to_smem %s1910_s0, 16, %s1630_s9, [#allocation4] }
   0x2   :  { %1594 = dma.done.wait [#allocation4], 16 }
   0x3   :  { %1595 = vsyncadd [#allocation4], 4294967280 }
   0x4   :  { %10 = sfence }
   0x5   :  { %11 = vsyncpa [#allocation7], 0  ;;  %s16_s12 = sld [smem:[#allocation5]]  ;;  %s1631_s13 = smov [#allocation2]  }
   0x6   :  { %s26_s14 = sshll.u32 %s1631_s13, 4  ;;  %s1668_s15 = sld [smem:[#allocation5 + $0x1]]  ;;  %s1670_s14 = int_to_ptr.vmem [resolvable:$true] %s26_s14 }
   0x7   :  { %s1632_s16 = smov [#allocation2 + $0x1]   ;;  %s1672_s18 = sld [smem:[#allocation5 + $0x2]] }
   0x8   :  { %s42_s17 = sshll.u32 %s1632_s16, 4  ;;  %s1633_s19 = smov [#allocation2 + $0x2]   ;;  %s1674_s17 = int_to_ptr.vmem [resolvable:$true] %s42_s17 }
   0x9   :  { %s58_s0 = sshll.u32 %s1633_s19, 4  ;;  %s1676_s20 = sld [smem:[#allocation5 + $0x3]]  ;;  %s1678_s0 = int_to_ptr.vmem [resolvable:$true] %s58_s0 }
   0xa   :  { %s1687_s29 = scalar_lea.hbm %s1911_s1, 1024 }
   0xb   :  { %s1099_s21 = sshll.u32 %s16_s12, 4 }
   0xc   :  { %s18_s24 = scalar_lea.hbm %s1911_s1, %s1099_s21  ;;  %s1101_s25 = sshll.u32 %s1668_s15, 4 }
   0xd   :  { %s1222_s26 = scalar_lea.hbm %s18_s24, 16  ;;  %p1225_p1 = scmp.lt.s32.totalorder %s18_s24, %s1911_s1 }
   0xe   :  { %p1223_p0 = scmp.ne.s32.totalorder %s18_s24, %s1222_s26  ;;  %p1226_p2 = scmp.lt.s32.totalorder %s1687_s29, %s1222_s26 }
  0x10   :  { %p1227_p3 = por %p1226_p2, %p1225_p1 }
  0x12   :  { %p1228_p4 = pnand %p1227_p3, %p1223_p0 }
  0x14   :  { %1231 = shalt.err (!%p1228_p4)  }
  0x15   :  { %s1232_s4 = scalar_lea.vmem %s1670_s14, 16  ;;  %s1696_s5 = scalar_lea.vmem %s1670_s14, 512 }
  0x16   :  { %p1233_p5 = scmp.ne.s32.totalorder %s1670_s14, %s1232_s4  ;;  %p1237_p6 = scmp.lt.s32.totalorder %s1670_s14, %s1670_s14 }
  0x17   :  { %p1238_p7 = scmp.lt.s32.totalorder %s1696_s5, %s1232_s4 }
  0x19   :  { %p1239_p8 = por %p1238_p7, %p1237_p6 }
  0x1b   :  { %p1240_p9 = pnand %p1239_p8, %p1233_p5 }
  0x1d   :  { %1243 = shalt.err (!%p1240_p9)  }
  0x1e   :  { %29 = dma.hbm_to_vmem [thread:$0]  %s18_s24, 16, %s1670_s14, [#allocation3] }
  0x1f   :  { %s32_s8 = scalar_lea.hbm %s1911_s1, %s1101_s25  ;;  %s1103_s9 = sshll.u32 %s1672_s18, 4 }
  0x20   :  { %s1244_s10 = scalar_lea.hbm %s32_s8, 16  ;;  %p1247_p11 = scmp.lt.s32.totalorder %s32_s8, %s1911_s1 }
  0x21   :  { %p1245_p10 = scmp.ne.s32.totalorder %s32_s8, %s1244_s10  ;;  %p1248_p12 = scmp.lt.s32.totalorder %s1687_s29, %s1244_s10 }
  0x23   :  { %p1249_p13 = por %p1248_p12, %p1247_p11 }
  0x25   :  { %p1250_p0 = pnand %p1249_p13, %p1245_p10 }
  0x27   :  { %1253 = shalt.err (!%p1250_p0)  }
  0x28   :  { %s1254_s13 = scalar_lea.vmem %s1674_s17, 16  ;;  %p1259_p2 = scmp.lt.s32.totalorder %s1674_s17, %s1670_s14 }
  0x29   :  { %p1255_p1 = scmp.ne.s32.totalorder %s1674_s17, %s1254_s13  ;;  %p1260_p3 = scmp.lt.s32.totalorder %s1696_s5, %s1254_s13 }
  0x2b   :  { %p1261_p4 = por %p1260_p3, %p1259_p2 }
  0x2d   :  { %p1262_p5 = pnand %p1261_p4, %p1255_p1 }
  0x2f   :  { %1265 = shalt.err (!%p1262_p5)  }
  0x30   :  { %45 = dma.hbm_to_vmem [thread:$0]  %s32_s8, 16, %s1674_s17, [#allocation3 + $0x1] }
  0x31   :  { %s48_s18 = scalar_lea.hbm %s1911_s1, %s1103_s9  ;;  %s1105_s19 = sshll.u32 %s1676_s20, 4 }
  0x32   :  { %s1266_s21 = scalar_lea.hbm %s48_s18, 16  ;;  %p1269_p7 = scmp.lt.s32.totalorder %s48_s18, %s1911_s1 }
  0x33   :  { %p1267_p6 = scmp.ne.s32.totalorder %s48_s18, %s1266_s21  ;;  %p1270_p8 = scmp.lt.s32.totalorder %s1687_s29, %s1266_s21 }
  0x35   :  { %p1271_p9 = por %p1270_p8, %p1269_p7 }
  0x37   :  { %p1272_p10 = pnand %p1271_p9, %p1267_p6 }
  0x39   :  { %1275 = shalt.err (!%p1272_p10)  }
  0x3a   :  { %s1276_s17 = scalar_lea.vmem %s1678_s0, 16  ;;  %p1281_p12 = scmp.lt.s32.totalorder %s1678_s0, %s1670_s14 }
  0x3b   :  { %p1277_p11 = scmp.ne.s32.totalorder %s1678_s0, %s1276_s17  ;;  %p1282_p13 = scmp.lt.s32.totalorder %s1696_s5, %s1276_s17 }
  0x3d   :  { %p1283_p0 = por %p1282_p13, %p1281_p12 }
  0x3f   :  { %p1284_p1 = pnand %p1283_p0, %p1277_p11 }
  0x41   :  { %1287 = shalt.err (!%p1284_p1)  }
  0x42   :  { %61 = dma.hbm_to_vmem [thread:$0]  %s48_s18, 16, %s1678_s0, [#allocation3 + $0x2] }
  0x43   :  { %s64_s25 = scalar_lea.hbm %s1911_s1, %s1105_s19  ;;  %s1634_s26 = smov [#allocation2 + $0x3]  }
  0x44   :  { %s74_s27 = sshll.u32 %s1634_s26, 4  ;;  %s1106_s28 = sld [smem:[#allocation5 + $0x4]]  ;;  %s75_s27 = int_to_ptr.vmem [resolvable:$true] %s74_s27 }
  0x45   :  { %s1288_s30 = scalar_lea.hbm %s64_s25, 16  ;;  %p1291_p3 = scmp.lt.s32.totalorder %s64_s25, %s1911_s1 }
  0x46   :  { %p1289_p2 = scmp.ne.s32.totalorder %s64_s25, %s1288_s30  ;;  %p1292_p4 = scmp.lt.s32.totalorder %s1687_s29, %s1288_s30 }
  0x48   :  { %p1293_p5 = por %p1292_p4, %p1291_p3 }
  0x4a   :  { %p1294_p6 = pnand %p1293_p5, %p1289_p2 }
  0x4c   :  { %1297 = shalt.err (!%p1294_p6)  }
  0x4d   :  { %s1298_s6 = scalar_lea.vmem %s75_s27, 16  ;;  %p1303_p8 = scmp.lt.s32.totalorder %s75_s27, %s1670_s14 }
  0x4e   :  { %p1299_p7 = scmp.ne.s32.totalorder %s75_s27, %s1298_s6  ;;  %p1304_p9 = scmp.lt.s32.totalorder %s1696_s5, %s1298_s6 }
  0x50   :  { %p1305_p10 = por %p1304_p9, %p1303_p8 }
  0x52   :  { %p1306_p11 = pnand %p1305_p10, %p1299_p7 }
  0x54   :  { %1309 = shalt.err (!%p1306_p11)  }
  0x55   :  { %77 = dma.hbm_to_vmem [thread:$0]  %s64_s25, 16, %s75_s27, [#allocation3 + $0x3] }
  0x56   :  { %s1635_s0 = smov [#allocation2 + $0x4]   ;;  %s1108_s8 = sld [smem:[#allocation5 + $0x5]] }
  0x57   :  { %s90_s7 = sshll.u32 %s1635_s0, 4  ;;  %s1636_s9 = smov [#allocation2 + $0x5]   ;;  %s91_s7 = int_to_ptr.vmem [resolvable:$true] %s90_s7 }
  0x58   :  { %s106_s10 = sshll.u32 %s1636_s9, 4  ;;  %s1739_s11 = sld [smem:[#allocation5 + $0x6]]  ;;  %s1741_s10 = int_to_ptr.vmem [resolvable:$true] %s106_s10 }
  0x59   :  { %s1107_s12 = sshll.u32 %s1106_s28, 4 }
  0x5a   :  { %s80_s16 = scalar_lea.hbm %s1911_s1, %s1107_s12 }
  0x5b   :  { %s1310_s18 = scalar_lea.hbm %s80_s16, 16  ;;  %p1313_p13 = scmp.lt.s32.totalorder %s80_s16, %s1911_s1 }
  0x5c   :  { %p1311_p12 = scmp.ne.s32.totalorder %s80_s16, %s1310_s18  ;;  %p1314_p0 = scmp.lt.s32.totalorder %s1687_s29, %s1310_s18 }
  0x5e   :  { %p1315_p1 = por %p1314_p0, %p1313_p13 }
  0x60   :  { %p1316_p2 = pnand %p1315_p1, %p1311_p12 }
  0x62   :  { %1319 = shalt.err (!%p1316_p2)  }
  0x63   :  { %s1320_s22 = scalar_lea.vmem %s91_s7, 16  ;;  %p1325_p4 = scmp.lt.s32.totalorder %s91_s7, %s1670_s14 }
  0x64   :  { %p1321_p3 = scmp.ne.s32.totalorder %s91_s7, %s1320_s22  ;;  %p1326_p5 = scmp.lt.s32.totalorder %s1696_s5, %s1320_s22 }
  0x66   :  { %p1327_p6 = por %p1326_p5, %p1325_p4 }
  0x68   :  { %p1328_p7 = pnand %p1327_p6, %p1321_p3 }
  0x6a   :  { %1331 = shalt.err (!%p1328_p7)  }
  0x6b   :  { %93 = dma.hbm_to_vmem [thread:$0]  %s80_s16, 16, %s91_s7, [#allocation3 + $0x4] }
  0x6c   :  { %s1109_s23 = sshll.u32 %s1108_s8, 4  ;;  %s1637_s17 = smov [#allocation2 + $0x6]  }
  0x6d   :  { %s122_s20 = sshll.u32 %s1637_s17, 4  ;;  %s96_s26 = scalar_lea.hbm %s1911_s1, %s1109_s23  ;;  %s1755_s20 = int_to_ptr.vmem [resolvable:$true] %s122_s20 }
  0x6e   :  { %s1332_s27 = scalar_lea.hbm %s96_s26, 16  ;;  %p1335_p9 = scmp.lt.s32.totalorder %s96_s26, %s1911_s1 }
  0x6f   :  { %p1333_p8 = scmp.ne.s32.totalorder %s96_s26, %s1332_s27  ;;  %p1336_p10 = scmp.lt.s32.totalorder %s1687_s29, %s1332_s27 }
  0x71   :  { %p1337_p11 = por %p1336_p10, %p1335_p9 }
  0x73   :  { %p1338_p12 = pnand %p1337_p11, %p1333_p8 }
  0x75   :  { %1341 = shalt.err (!%p1338_p12)  }
  0x76   :  { %s1342_s3 = scalar_lea.vmem %s1741_s10, 16  ;;  %p1347_p0 = scmp.lt.s32.totalorder %s1741_s10, %s1670_s14 }
  0x77   :  { %p1343_p13 = scmp.ne.s32.totalorder %s1741_s10, %s1342_s3  ;;  %p1348_p1 = scmp.lt.s32.totalorder %s1696_s5, %s1342_s3 }
  0x79   :  { %p1349_p2 = por %p1348_p1, %p1347_p0 }
  0x7b   :  { %p1350_p3 = pnand %p1349_p2, %p1343_p13 }
  0x7d   :  { %1353 = shalt.err (!%p1350_p3)  }
  0x7e   :  { %109 = dma.hbm_to_vmem [thread:$0]  %s96_s26, 16, %s1741_s10, [#allocation3 + $0x5] }
  0x7f   :  { %s1111_s4 = sshll.u32 %s1739_s11, 4  ;;  %s1112_s6 = sld [smem:[#allocation5 + $0x7]] }
  0x80   :  { %s112_s8 = scalar_lea.hbm %s1911_s1, %s1111_s4 }
  0x81   :  { %s1354_s9 = scalar_lea.hbm %s112_s8, 16  ;;  %p1357_p5 = scmp.lt.s32.totalorder %s112_s8, %s1911_s1 }
  0x82   :  { %p1355_p4 = scmp.ne.s32.totalorder %s112_s8, %s1354_s9  ;;  %p1358_p6 = scmp.lt.s32.totalorder %s1687_s29, %s1354_s9 }
  0x84   :  { %p1359_p7 = por %p1358_p6, %p1357_p5 }
  0x86   :  { %p1360_p8 = pnand %p1359_p7, %p1355_p4 }
  0x88   :  { %1363 = shalt.err (!%p1360_p8)  }
  0x89   :  { %s1364_s10 = scalar_lea.vmem %s1755_s20, 16  ;;  %p1369_p10 = scmp.lt.s32.totalorder %s1755_s20, %s1670_s14 }
  0x8a   :  { %p1365_p9 = scmp.ne.s32.totalorder %s1755_s20, %s1364_s10  ;;  %p1370_p11 = scmp.lt.s32.totalorder %s1696_s5, %s1364_s10 }
  0x8c   :  { %p1371_p12 = por %p1370_p11, %p1369_p10 }
  0x8e   :  { %p1372_p13 = pnand %p1371_p12, %p1365_p9 }
  0x90   :  { %1375 = shalt.err (!%p1372_p13)  }
  0x91   :  { %125 = dma.hbm_to_vmem [thread:$0]  %s112_s8, 16, %s1755_s20, [#allocation3 + $0x6] }
  0x92   :  { %s1638_s11 = smov [#allocation2 + $0x7]   ;;  %s1114_s16 = sld [smem:[#allocation5 + $0x8]] }
  0x93   :  { %s138_s15 = sshll.u32 %s1638_s11, 4  ;;  %s1639_s18 = smov [#allocation2 + $0x8]   ;;  %s139_s15 = int_to_ptr.vmem [resolvable:$true] %s138_s15 }
  0x94   :  { %s154_s19 = sshll.u32 %s1639_s18, 4  ;;  %s1781_s21 = sld [smem:[#allocation5 + $0x9]]  ;;  %s1783_s19 = int_to_ptr.vmem [resolvable:$true] %s154_s19 }
  0x95   :  { %s1113_s22 = sshll.u32 %s1112_s6, 4 }
  0x96   :  { %s128_s24 = scalar_lea.hbm %s1911_s1, %s1113_s22 }
  0x97   :  { %s1376_s25 = scalar_lea.hbm %s128_s24, 16  ;;  %p1379_p1 = scmp.lt.s32.totalorder %s128_s24, %s1911_s1 }
  0x98   :  { %p1377_p0 = scmp.ne.s32.totalorder %s128_s24, %s1376_s25  ;;  %p1380_p2 = scmp.lt.s32.totalorder %s1687_s29, %s1376_s25 }
  0x9a   :  { %p1381_p3 = por %p1380_p2, %p1379_p1 }
  0x9c   :  { %p1382_p4 = pnand %p1381_p3, %p1377_p0 }
  0x9e   :  { %1385 = shalt.err (!%p1382_p4)  }
  0x9f   :  { %s1386_s20 = scalar_lea.vmem %s139_s15, 16  ;;  %p1391_p6 = scmp.lt.s32.totalorder %s139_s15, %s1670_s14 }
  0xa0   :  { %p1387_p5 = scmp.ne.s32.totalorder %s139_s15, %s1386_s20  ;;  %p1392_p7 = scmp.lt.s32.totalorder %s1696_s5, %s1386_s20 }
  0xa2   :  { %p1393_p8 = por %p1392_p7, %p1391_p6 }
  0xa4   :  { %p1394_p9 = pnand %p1393_p8, %p1387_p5 }
  0xa6   :  { %1397 = shalt.err (!%p1394_p9)  }
  0xa7   :  { %141 = dma.hbm_to_vmem [thread:$0]  %s128_s24, 16, %s139_s15, [#allocation3 + $0x7] }
  0xa8   :  { %s1115_s28 = sshll.u32 %s1114_s16, 4  ;;  %s1640_s30 = smov [#allocation2 + $0x9]  }
  0xa9   :  { %s170_s3 = sshll.u32 %s1640_s30, 4  ;;  %s144_s0 = scalar_lea.hbm %s1911_s1, %s1115_s28  ;;  %s1797_s3 = int_to_ptr.vmem [resolvable:$true] %s170_s3 }
  0xaa   :  { %s1398_s7 = scalar_lea.hbm %s144_s0, 16  ;;  %p1401_p11 = scmp.lt.s32.totalorder %s144_s0, %s1911_s1 }
  0xab   :  { %p1399_p10 = scmp.ne.s32.totalorder %s144_s0, %s1398_s7  ;;  %p1402_p12 = scmp.lt.s32.totalorder %s1687_s29, %s1398_s7 }
  0xad   :  { %p1403_p13 = por %p1402_p12, %p1401_p11 }
  0xaf   :  { %p1404_p0 = pnand %p1403_p13, %p1399_p10 }
  0xb1   :  { %1407 = shalt.err (!%p1404_p0)  }
  0xb2   :  { %s1408_s12 = scalar_lea.vmem %s1783_s19, 16  ;;  %p1413_p2 = scmp.lt.s32.totalorder %s1783_s19, %s1670_s14 }
  0xb3   :  { %p1409_p1 = scmp.ne.s32.totalorder %s1783_s19, %s1408_s12  ;;  %p1414_p3 = scmp.lt.s32.totalorder %s1696_s5, %s1408_s12 }
  0xb5   :  { %p1415_p4 = por %p1414_p3, %p1413_p2 }
  0xb7   :  { %p1416_p5 = pnand %p1415_p4, %p1409_p1 }
  0xb9   :  { %1419 = shalt.err (!%p1416_p5)  }
  0xba   :  { %157 = dma.hbm_to_vmem [thread:$0]  %s144_s0, 16, %s1783_s19, [#allocation3 + $0x8] }
  0xbb   :  { %s1117_s13 = sshll.u32 %s1781_s21, 4  ;;  %s1118_s10 = sld [smem:[#allocation5 + $0xa]] }
  0xbc   :  { %s160_s16 = scalar_lea.hbm %s1911_s1, %s1117_s13 }
  0xbd   :  { %s1420_s18 = scalar_lea.hbm %s160_s16, 16  ;;  %p1423_p7 = scmp.lt.s32.totalorder %s160_s16, %s1911_s1 }
  0xbe   :  { %p1421_p6 = scmp.ne.s32.totalorder %s160_s16, %s1420_s18  ;;  %p1424_p8 = scmp.lt.s32.totalorder %s1687_s29, %s1420_s18 }
  0xc0   :  { %p1425_p9 = por %p1424_p8, %p1423_p7 }
  0xc2   :  { %p1426_p10 = pnand %p1425_p9, %p1421_p6 }
  0xc4   :  { %1429 = shalt.err (!%p1426_p10)  }
  0xc5   :  { %s1430_s19 = scalar_lea.vmem %s1797_s3, 16  ;;  %p1435_p12 = scmp.lt.s32.totalorder %s1797_s3, %s1670_s14 }
  0xc6   :  { %p1431_p11 = scmp.ne.s32.totalorder %s1797_s3, %s1430_s19  ;;  %p1436_p13 = scmp.lt.s32.totalorder %s1696_s5, %s1430_s19 }
  0xc8   :  { %p1437_p0 = por %p1436_p13, %p1435_p12 }
  0xca   :  { %p1438_p1 = pnand %p1437_p0, %p1431_p11 }
  0xcc   :  { %1441 = shalt.err (!%p1438_p1)  }
  0xcd   :  { %173 = dma.hbm_to_vmem [thread:$0]  %s160_s16, 16, %s1797_s3, [#allocation3 + $0x9] }
  0xce   :  { %s1641_s21 = smov [#allocation2 + $0xa]   ;;  %s1120_s24 = sld [smem:[#allocation5 + $0xb]] }
  0xcf   :  { %s186_s17 = sshll.u32 %s1641_s21, 4  ;;  %s1642_s25 = smov [#allocation2 + $0xb]   ;;  %s187_s17 = int_to_ptr.vmem [resolvable:$true] %s186_s17 }
  0xd0   :  { %s202_s26 = sshll.u32 %s1642_s25, 4  ;;  %s1823_s27 = sld [smem:[#allocation5 + $0xc]]  ;;  %s1825_s26 = int_to_ptr.vmem [resolvable:$true] %s202_s26 }
  0xd1   :  { %s1119_s20 = sshll.u32 %s1118_s10, 4 }
  0xd2   :  { %s176_s4 = scalar_lea.hbm %s1911_s1, %s1119_s20 }
  0xd3   :  { %s1442_s6 = scalar_lea.hbm %s176_s4, 16  ;;  %p1445_p3 = scmp.lt.s32.totalorder %s176_s4, %s1911_s1 }
  0xd4   :  { %p1443_p2 = scmp.ne.s32.totalorder %s176_s4, %s1442_s6  ;;  %p1446_p4 = scmp.lt.s32.totalorder %s1687_s29, %s1442_s6 }
  0xd6   :  { %p1447_p5 = por %p1446_p4, %p1445_p3 }
  0xd8   :  { %p1448_p6 = pnand %p1447_p5, %p1443_p2 }
  0xda   :  { %1451 = shalt.err (!%p1448_p6)  }
  0xdb   :  { %s1452_s3 = scalar_lea.vmem %s187_s17, 16  ;;  %p1457_p8 = scmp.lt.s32.totalorder %s187_s17, %s1670_s14 }
  0xdc   :  { %p1453_p7 = scmp.ne.s32.totalorder %s187_s17, %s1452_s3  ;;  %p1458_p9 = scmp.lt.s32.totalorder %s1696_s5, %s1452_s3 }
  0xde   :  { %p1459_p10 = por %p1458_p9, %p1457_p8 }
  0xe0   :  { %p1460_p11 = pnand %p1459_p10, %p1453_p7 }
  0xe2   :  { %1463 = shalt.err (!%p1460_p11)  }
  0xe3   :  { %189 = dma.hbm_to_vmem [thread:$0]  %s176_s4, 16, %s187_s17, [#allocation3 + $0xa] }
  0xe4   :  { %s1121_s8 = sshll.u32 %s1120_s24, 4  ;;  %s1643_s9 = smov [#allocation2 + $0xc]  }
  0xe5   :  { %s218_s12 = sshll.u32 %s1643_s9, 4  ;;  %s192_s11 = scalar_lea.hbm %s1911_s1, %s1121_s8  ;;  %s1839_s12 = int_to_ptr.vmem [resolvable:$true] %s218_s12 }
  0xe6   :  { %s1464_s15 = scalar_lea.hbm %s192_s11, 16  ;;  %p1467_p13 = scmp.lt.s32.totalorder %s192_s11, %s1911_s1 }
  0xe7   :  { %p1465_p12 = scmp.ne.s32.totalorder %s192_s11, %s1464_s15  ;;  %p1468_p0 = scmp.lt.s32.totalorder %s1687_s29, %s1464_s15 }
  0xe9   :  { %p1469_p1 = por %p1468_p0, %p1467_p13 }
  0xeb   :  { %p1470_p2 = pnand %p1469_p1, %p1465_p12 }
  0xed   :  { %1473 = shalt.err (!%p1470_p2)  }
  0xee   :  { %s1474_s22 = scalar_lea.vmem %s1825_s26, 16  ;;  %p1479_p4 = scmp.lt.s32.totalorder %s1825_s26, %s1670_s14 }
  0xef   :  { %p1475_p3 = scmp.ne.s32.totalorder %s1825_s26, %s1474_s22  ;;  %p1480_p5 = scmp.lt.s32.totalorder %s1696_s5, %s1474_s22 }
  0xf1   :  { %p1481_p6 = por %p1480_p5, %p1479_p4 }
  0xf3   :  { %p1482_p7 = pnand %p1481_p6, %p1475_p3 }
  0xf5   :  { %1485 = shalt.err (!%p1482_p7)  }
  0xf6   :  { %205 = dma.hbm_to_vmem [thread:$0]  %s192_s11, 16, %s1825_s26, [#allocation3 + $0xb] }
  0xf7   :  { %s1123_s23 = sshll.u32 %s1823_s27, 4  ;;  %s1124_s19 = sld [smem:[#allocation5 + $0xd]] }
  0xf8   :  { %s208_s24 = scalar_lea.hbm %s1911_s1, %s1123_s23 }
  0xf9   :  { %s1486_s25 = scalar_lea.hbm %s208_s24, 16  ;;  %p1489_p9 = scmp.lt.s32.totalorder %s208_s24, %s1911_s1 }
  0xfa   :  { %p1487_p8 = scmp.ne.s32.totalorder %s208_s24, %s1486_s25  ;;  %p1490_p10 = scmp.lt.s32.totalorder %s1687_s29, %s1486_s25 }
  0xfc   :  { %p1491_p11 = por %p1490_p10, %p1489_p9 }
  0xfe   :  { %p1492_p12 = pnand %p1491_p11, %p1487_p8 }
 0x100   :  { %1495 = shalt.err (!%p1492_p12)  }
 0x101   :  { %s1496_s26 = scalar_lea.vmem %s1839_s12, 16  ;;  %p1501_p0 = scmp.lt.s32.totalorder %s1839_s12, %s1670_s14 }
 0x102   :  { %p1497_p13 = scmp.ne.s32.totalorder %s1839_s12, %s1496_s26  ;;  %p1502_p1 = scmp.lt.s32.totalorder %s1696_s5, %s1496_s26 }
 0x104   :  { %p1503_p2 = por %p1502_p1, %p1501_p0 }
 0x106   :  { %p1504_p3 = pnand %p1503_p2, %p1497_p13 }
 0x108   :  { %1507 = shalt.err (!%p1504_p3)  }
 0x109   :  { %221 = dma.hbm_to_vmem [thread:$0]  %s208_s24, 16, %s1839_s12, [#allocation3 + $0xc] }
 0x10a   :  { %s1644_s27 = smov [#allocation2 + $0xd]   ;;  %s1126_s4 = sld [smem:[#allocation5 + $0xe]] }
 0x10b   :  { %s234_s30 = sshll.u32 %s1644_s27, 4  ;;  %s1645_s6 = smov [#allocation2 + $0xe]   ;;  %s235_s30 = int_to_ptr.vmem [resolvable:$true] %s234_s30 }
 0x10c   :  { %s250_s0 = sshll.u32 %s1645_s6, 4  ;;  %s1865_s7 = sld [smem:[#allocation5 + $0xf]]  ;;  %s1867_s0 = int_to_ptr.vmem [resolvable:$true] %s250_s0 }
 0x10d   :  { %s1125_s3 = sshll.u32 %s1124_s19, 4 }
 0x10e   :  { %s224_s13 = scalar_lea.hbm %s1911_s1, %s1125_s3 }
 0x10f   :  { %s1508_s10 = scalar_lea.hbm %s224_s13, 16  ;;  %p1511_p5 = scmp.lt.s32.totalorder %s224_s13, %s1911_s1 }
 0x110   :  { %p1509_p4 = scmp.ne.s32.totalorder %s224_s13, %s1508_s10  ;;  %p1512_p6 = scmp.lt.s32.totalorder %s1687_s29, %s1508_s10 }
 0x112   :  { %p1513_p7 = por %p1512_p6, %p1511_p5 }
 0x114   :  { %p1514_p8 = pnand %p1513_p7, %p1509_p4 }
 0x116   :  { %1517 = shalt.err (!%p1514_p8)  }
 0x117   :  { %s1518_s12 = scalar_lea.vmem %s235_s30, 16  ;;  %p1523_p10 = scmp.lt.s32.totalorder %s235_s30, %s1670_s14 }
 0x118   :  { %p1519_p9 = scmp.ne.s32.totalorder %s235_s30, %s1518_s12  ;;  %p1524_p11 = scmp.lt.s32.totalorder %s1696_s5, %s1518_s12 }
 0x11a   :  { %p1525_p12 = por %p1524_p11, %p1523_p10 }
 0x11c   :  { %p1526_p13 = pnand %p1525_p12, %p1519_p9 }
 0x11e   :  { %1529 = shalt.err (!%p1526_p13)  }
 0x11f   :  { %237 = dma.hbm_to_vmem [thread:$0]  %s224_s13, 16, %s235_s30, [#allocation3 + $0xd] }
 0x120   :  { %s1127_s16 = sshll.u32 %s1126_s4, 4  ;;  %s1646_s18 = smov [#allocation2 + $0xf]  }
 0x121   :  { %s266_s22 = sshll.u32 %s1646_s18, 4  ;;  %s240_s21 = scalar_lea.hbm %s1911_s1, %s1127_s16  ;;  %s1881_s22 = int_to_ptr.vmem [resolvable:$true] %s266_s22 }
 0x122   :  { %s1530_s17 = scalar_lea.hbm %s240_s21, 16  ;;  %p1533_p1 = scmp.lt.s32.totalorder %s240_s21, %s1911_s1 }
 0x123   :  { %p1531_p0 = scmp.ne.s32.totalorder %s240_s21, %s1530_s17  ;;  %p1534_p2 = scmp.lt.s32.totalorder %s1687_s29, %s1530_s17 }
 0x125   :  { %p1535_p3 = por %p1534_p2, %p1533_p1 }
 0x127   :  { %p1536_p4 = pnand %p1535_p3, %p1531_p0 }
 0x129   :  { %1539 = shalt.err (!%p1536_p4)  }
 0x12a   :  { %s1540_s20 = scalar_lea.vmem %s1867_s0, 16  ;;  %p1545_p6 = scmp.lt.s32.totalorder %s1867_s0, %s1670_s14 }
 0x12b   :  { %p1541_p5 = scmp.ne.s32.totalorder %s1867_s0, %s1540_s20  ;;  %p1546_p7 = scmp.lt.s32.totalorder %s1696_s5, %s1540_s20 }
 0x12d   :  { %p1547_p8 = por %p1546_p7, %p1545_p6 }
 0x12f   :  { %p1548_p9 = pnand %p1547_p8, %p1541_p5 }
 0x131   :  { %1551 = shalt.err (!%p1548_p9)  }
 0x132   :  { %253 = dma.hbm_to_vmem [thread:$0]  %s240_s21, 16, %s1867_s0, [#allocation3 + $0xe] }
 0x133   :  { %s1129_s28 = sshll.u32 %s1865_s7, 4 }
 0x134   :  { %s256_s30 = scalar_lea.hbm %s1911_s1, %s1129_s28 }
 0x135   :  { %s1552_s4 = scalar_lea.hbm %s256_s30, 16  ;;  %p1555_p11 = scmp.lt.s32.totalorder %s256_s30, %s1911_s1 }
 0x136   :  { %p1553_p10 = scmp.ne.s32.totalorder %s256_s30, %s1552_s4  ;;  %p1556_p12 = scmp.lt.s32.totalorder %s1687_s29, %s1552_s4 }
 0x138   :  { %p1557_p13 = por %p1556_p12, %p1555_p11 }
 0x13a   :  { %p1558_p0 = pnand %p1557_p13, %p1553_p10 }
 0x13c   :  { %1561 = shalt.err (!%p1558_p0)  }
 0x13d   :  { %s1562_s0 = scalar_lea.vmem %s1881_s22, 16  ;;  %p1567_p2 = scmp.lt.s32.totalorder %s1881_s22, %s1670_s14 }
 0x13e   :  { %p1563_p1 = scmp.ne.s32.totalorder %s1881_s22, %s1562_s0  ;;  %p1568_p3 = scmp.lt.s32.totalorder %s1696_s5, %s1562_s0 }
 0x140   :  { %p1569_p4 = por %p1568_p3, %p1567_p2 }
 0x142   :  { %p1570_p5 = pnand %p1569_p4, %p1563_p1 }
 0x144   :  { %1573 = shalt.err (!%p1570_p5)  }
 0x145   :  { %269 = dma.hbm_to_vmem [thread:$0]  %s256_s30, 16, %s1881_s22, [#allocation3 + $0xf] }
 0x146   :  { %1596 = dma.done.wait [#allocation3], 16 }
 0x147   :  { %1597 = vsyncadd [#allocation3], 4294967280 }
 0x148   :  { %1598 = dma.done.wait [#allocation3 + $0x1], 16 }
 0x149   :  { %1599 = vsyncadd [#allocation3 + $0x1], 4294967280 }
 0x14a   :  { %1600 = dma.done.wait [#allocation3 + $0x2], 16 }
 0x14b   :  { %1601 = vsyncadd [#allocation3 + $0x2], 4294967280 }
 0x14c   :  { %1602 = dma.done.wait [#allocation3 + $0x3], 16 }
 0x14d   :  { %1603 = vsyncadd [#allocation3 + $0x3], 4294967280 }
 0x14e   :  { %1604 = dma.done.wait [#allocation3 + $0x4], 16 }
 0x14f   :  { %1605 = vsyncadd [#allocation3 + $0x4], 4294967280 }
 0x150   :  { %1606 = dma.done.wait [#allocation3 + $0x5], 16 }
 0x151   :  { %1607 = vsyncadd [#allocation3 + $0x5], 4294967280 }
 0x152   :  { %1608 = dma.done.wait [#allocation3 + $0x6], 16 }
 0x153   :  { %1609 = vsyncadd [#allocation3 + $0x6], 4294967280 }
 0x154   :  { %1610 = dma.done.wait [#allocation3 + $0x7], 16 }
 0x155   :  { %1611 = vsyncadd [#allocation3 + $0x7], 4294967280 }
 0x156   :  { %1612 = dma.done.wait [#allocation3 + $0x8], 16 }
 0x157   :  { %1613 = vsyncadd [#allocation3 + $0x8], 4294967280 }
 0x158   :  { %1614 = dma.done.wait [#allocation3 + $0x9], 16 }
 0x159   :  { %1615 = vsyncadd [#allocation3 + $0x9], 4294967280 }
 0x15a   :  { %1616 = dma.done.wait [#allocation3 + $0xa], 16 }
 0x15b   :  { %1617 = vsyncadd [#allocation3 + $0xa], 4294967280 }
 0x15c   :  { %1618 = dma.done.wait [#allocation3 + $0xb], 16 }
 0x15d   :  { %1619 = vsyncadd [#allocation3 + $0xb], 4294967280 }
 0x15e   :  { %1620 = dma.done.wait [#allocation3 + $0xc], 16 }
 0x15f   :  { %1621 = vsyncadd [#allocation3 + $0xc], 4294967280 }
 0x160   :  { %1622 = dma.done.wait [#allocation3 + $0xd], 16 }
 0x161   :  { %1623 = vsyncadd [#allocation3 + $0xd], 4294967280 }
 0x162   :  { %1624 = dma.done.wait [#allocation3 + $0xe], 16 }
 0x163   :  { %1625 = vsyncadd [#allocation3 + $0xe], 4294967280 }
 0x164   :  { %1626 = dma.done.wait [#allocation3 + $0xf], 16 }
 0x165   :  { %1627 = vsyncadd [#allocation3 + $0xf], 4294967280  ;;  %s1647_s1 = smov [#allocation6]   ;;  %v649_v0 = vld [vmem:[#allocation2] sm:$0xff]  ;;  %v650_v1 = vld [vmem:[#allocation2 + $0x8] sm:$0xff] }
 0x166   :  { %s658_s14 = sshll.u32 %s1647_s1, 4  ;;  %651 = vst [vmem:[#allocation6] sm:$0xff] %v649_v0  ;;  %652 = vst [vmem:[#allocation6 + $0x8] sm:$0xff] %v650_v1  ;;  %s659_s14 = int_to_ptr.vmem [resolvable:$true] %s658_s14 }
 0x167   :  { %s1574_s29 = scalar_lea.vmem %s659_s14, 256  ;;  %p1579_p7 = scmp.lt.s32.totalorder %s659_s14, %s659_s14 }
 0x168   :  { %p1575_p6 = scmp.ne.s32.totalorder %s659_s14, %s1574_s29  ;;  %p1580_p8 = scmp.lt.s32.totalorder %s1574_s29, %s1574_s29 }
 0x16a   :  { %p1581_p9 = por %p1580_p8, %p1579_p7 }
 0x16c   :  { %p1582_p10 = pnand %p1581_p9, %p1575_p6 }
 0x16e   :  { %1585 = shalt.err (!%p1582_p10)
}
 0x16f   :  { %s1648_s5 = smov 128   ;;  %s1649_s7 = smov 8  }
 0x170   :  { %664 = dma.vmem_to_hbm [thread:$0]  %s659_s14, 256, %s1912_s2, [#allocation7], %s1648_s5, %s1648_s5, %s1649_s7  }
 0x171   :  { %1628 = dma.done.wait [#allocation7], 256  }
 0x172   :  { %1629 = vsyncadd [#allocation7], 4294967040 }
 0x173   :  { %668 = vsyncpa [#allocation7], 1 }
 0x174   :  { %669 = vsyncmov [#allocation3] }
 0x177   :  { %s670_s13 = vpop.sfrf %669 }
 0x178   :  { %p1162_p11 = scmp.ne.s32.totalorder %s670_s13, 0 }
 0x17a   :  { %674 = shalt.err (%p1162_p11)  }
 0x17b   :  { %676 = vsyncmov [#allocation3 + $0x1] }
 0x17e   :  { %s677_s10 = vpop.sfrf %676 }
 0x17f   :  { %p1163_p12 = scmp.ne.s32.totalorder %s677_s10, 0 }
 0x181   :  { %681 = shalt.err (%p1163_p12)  }
 0x182   :  { %683 = vsyncmov [#allocation3 + $0x2] }
 0x185   :  { %s684_s11 = vpop.sfrf %683 }
 0x186   :  { %p1164_p13 = scmp.ne.s32.totalorder %s684_s11, 0 }
 0x188   :  { %688 = shalt.err (%p1164_p13)  }
 0x189   :  { %690 = vsyncmov [#allocation3 + $0x3] }
 0x18c   :  { %s691_s15 = vpop.sfrf %690 }
 0x18d   :  { %p1165_p0 = scmp.ne.s32.totalorder %s691_s15, 0 }
 0x18f   :  { %695 = shalt.err (%p1165_p0)  }
 0x190   :  { %697 = vsyncmov [#allocation3 + $0x4] }
 0x193   :  { %s698_s2 = vpop.sfrf %697 }
 0x194   :  { %p1166_p1 = scmp.ne.s32.totalorder %s698_s2, 0 }
 0x196   :  { %702 = shalt.err (%p1166_p1)  }
 0x197   :  { %704 = vsyncmov [#allocation3 + $0x5] }
 0x19a   :  { %s705_s12 = vpop.sfrf %704 }
 0x19b   :  { %p1167_p2 = scmp.ne.s32.totalorder %s705_s12, 0 }
 0x19d   :  { %709 = shalt.err (%p1167_p2)  }
 0x19e   :  { %711 = vsyncmov [#allocation3 + $0x6] }
 0x1a1   :  { %s712_s16 = vpop.sfrf %711 }
 0x1a2   :  { %p1168_p3 = scmp.ne.s32.totalorder %s712_s16, 0 }
 0x1a4   :  { %716 = shalt.err (%p1168_p3)  }
 0x1a5   :  { %718 = vsyncmov [#allocation3 + $0x7] }
 0x1a8   :  { %s719_s18 = vpop.sfrf %718 }
 0x1a9   :  { %p1169_p4 = scmp.ne.s32.totalorder %s719_s18, 0 }
 0x1ab   :  { %723 = shalt.err (%p1169_p4)  }
 0x1ac   :  { %725 = vsyncmov [#allocation3 + $0x8] }
 0x1af   :  { %s726_s22 = vpop.sfrf %725 }
 0x1b0   :  { %p1170_p5 = scmp.ne.s32.totalorder %s726_s22, 0 }
 0x1b2   :  { %730 = shalt.err (%p1170_p5)  }
 0x1b3   :  { %732 = vsyncmov [#allocation3 + $0x9] }
 0x1b6   :  { %s733_s23 = vpop.sfrf %732 }
 0x1b7   :  { %p1171_p6 = scmp.ne.s32.totalorder %s733_s23, 0 }
 0x1b9   :  { %737 = shalt.err (%p1171_p6)  }
 0x1ba   :  { %739 = vsyncmov [#allocation3 + $0xa] }
 0x1bd   :  { %s740_s19 = vpop.sfrf %739 }
 0x1be   :  { %p1172_p7 = scmp.ne.s32.totalorder %s740_s19, 0 }
 0x1c0   :  { %744 = shalt.err (%p1172_p7)  }
 0x1c1   :  { %746 = vsyncmov [#allocation3 + $0xb] }
 0x1c4   :  { %s747_s21 = vpop.sfrf %746 }
 0x1c5   :  { %p1173_p8 = scmp.ne.s32.totalorder %s747_s21, 0 }
 0x1c7   :  { %751 = shalt.err (%p1173_p8)  }
 0x1c8   :  { %753 = vsyncmov [#allocation3 + $0xc] }
 0x1cb   :  { %s754_s17 = vpop.sfrf %753 }
 0x1cc   :  { %p1174_p9 = scmp.ne.s32.totalorder %s754_s17, 0 }
 0x1ce   :  { %758 = shalt.err (%p1174_p9)  }
 0x1cf   :  { %760 = vsyncmov [#allocation3 + $0xd] }
 0x1d2   :  { %s761_s24 = vpop.sfrf %760 }
 0x1d3   :  { %p1175_p10 = scmp.ne.s32.totalorder %s761_s24, 0 }
 0x1d5   :  { %765 = shalt.err (%p1175_p10)  }
 0x1d6   :  { %767 = vsyncmov [#allocation3 + $0xe] }
 0x1d9   :  { %s768_s25 = vpop.sfrf %767 }
 0x1da   :  { %p1176_p11 = scmp.ne.s32.totalorder %s768_s25, 0 }
 0x1dc   :  { %772 = shalt.err (%p1176_p11)  }
 0x1dd   :  { %774 = vsyncmov [#allocation3 + $0xf] }
 0x1e0   :  { %s775_s20 = vpop.sfrf %774 }
 0x1e1   :  { %p1177_p12 = scmp.ne.s32.totalorder %s775_s20, 0 }
 0x1e3   :  { %779 = shalt.err (%p1177_p12)  }
 0x1e4   :  { %781 = vsyncmov [#allocation3 + $0x10] }
 0x1e7   :  { %s782_s28 = vpop.sfrf %781 }
 0x1e8   :  { %p1178_p13 = scmp.ne.s32.totalorder %s782_s28, 0 }
 0x1ea   :  { %786 = shalt.err (%p1178_p13)  }
 0x1eb   :  { %788 = vsyncmov [#allocation3 + $0x11] }
 0x1ee   :  { %s789_s26 = vpop.sfrf %788 }
 0x1ef   :  { %p1179_p0 = scmp.ne.s32.totalorder %s789_s26, 0 }
 0x1f1   :  { %793 = shalt.err (%p1179_p0)  }
 0x1f2   :  { %795 = vsyncmov [#allocation3 + $0x12] }
 0x1f5   :  { %s796_s27 = vpop.sfrf %795 }
 0x1f6   :  { %p1180_p1 = scmp.ne.s32.totalorder %s796_s27, 0 }
 0x1f8   :  { %800 = shalt.err (%p1180_p1)  }
 0x1f9   :  { %802 = vsyncmov [#allocation3 + $0x13] }
 0x1fc   :  { %s803_s30 = vpop.sfrf %802 }
 0x1fd   :  { %p1181_p2 = scmp.ne.s32.totalorder %s803_s30, 0 }
 0x1ff   :  { %807 = shalt.err (%p1181_p2)  }
 0x200   :  { %809 = vsyncmov [#allocation3 + $0x14] }
 0x203   :  { %s810_s4 = vpop.sfrf %809 }
 0x204   :  { %p1182_p3 = scmp.ne.s32.totalorder %s810_s4, 0 }
 0x206   :  { %814 = shalt.err (%p1182_p3)  }
 0x207   :  { %816 = vsyncmov [#allocation3 + $0x15] }
 0x20a   :  { %s817_s6 = vpop.sfrf %816 }
 0x20b   :  { %p1183_p4 = scmp.ne.s32.totalorder %s817_s6, 0 }
 0x20d   :  { %821 = shalt.err (%p1183_p4)  }
 0x20e   :  { %823 = vsyncmov [#allocation3 + $0x16] }
 0x211   :  { %s824_s3 = vpop.sfrf %823 }
 0x212   :  { %p1184_p5 = scmp.ne.s32.totalorder %s824_s3, 0 }
 0x214   :  { %828 = shalt.err (%p1184_p5)  }
 0x215   :  { %830 = vsyncmov [#allocation3 + $0x17] }
 0x218   :  { %s831_s0 = vpop.sfrf %830 }
 0x219   :  { %p1185_p6 = scmp.ne.s32.totalorder %s831_s0, 0 }
 0x21b   :  { %835 = shalt.err (%p1185_p6)  }
 0x21c   :  { %837 = vsyncmov [#allocation3 + $0x18] }
 0x21f   :  { %s838_s1 = vpop.sfrf %837 }
 0x220   :  { %p1186_p7 = scmp.ne.s32.totalorder %s838_s1, 0 }
 0x222   :  { %842 = shalt.err (%p1186_p7)  }
 0x223   :  { %844 = vsyncmov [#allocation3 + $0x19] }
 0x226   :  { %s845_s14 = vpop.sfrf %844 }
 0x227   :  { %p1187_p8 = scmp.ne.s32.totalorder %s845_s14, 0 }
 0x229   :  { %849 = shalt.err (%p1187_p8)  }
 0x22a   :  { %851 = vsyncmov [#allocation3 + $0x1a] }
 0x22d   :  { %s852_s29 = vpop.sfrf %851 }
 0x22e   :  { %p1188_p9 = scmp.ne.s32.totalorder %s852_s29, 0 }
 0x230   :  { %856 = shalt.err (%p1188_p9)  }
 0x231   :  { %858 = vsyncmov [#allocation3 + $0x1b] }
 0x234   :  { %s859_s5 = vpop.sfrf %858 }
 0x235   :  { %p1189_p10 = scmp.ne.s32.totalorder %s859_s5, 0 }
 0x237   :  { %863 = shalt.err (%p1189_p10)  }
 0x238   :  { %865 = vsyncmov [#allocation3 + $0x1c] }
 0x23b   :  { %s866_s7 = vpop.sfrf %865 }
 0x23c   :  { %p1190_p11 = scmp.ne.s32.totalorder %s866_s7, 0 }
 0x23e   :  { %870 = shalt.err (%p1190_p11)  }
 0x23f   :  { %872 = vsyncmov [#allocation3 + $0x1d] }
 0x242   :  { %s873_s8 = vpop.sfrf %872 }
 0x243   :  { %p1191_p12 = scmp.ne.s32.totalorder %s873_s8, 0 }
 0x245   :  { %877 = shalt.err (%p1191_p12)  }
 0x246   :  { %879 = vsyncmov [#allocation3 + $0x1e] }
 0x249   :  { %s880_s9 = vpop.sfrf %879 }
 0x24a   :  { %p1192_p13 = scmp.ne.s32.totalorder %s880_s9, 0 }
 0x24c   :  { %884 = shalt.err (%p1192_p13)  }
 0x24d   :  { %886 = vsyncmov [#allocation3 + $0x1f] }
 0x250   :  { %s887_s13 = vpop.sfrf %886 }
 0x251   :  { %p1193_p0 = scmp.ne.s32.totalorder %s887_s13, 0 }
 0x253   :  { %891 = shalt.err (%p1193_p0)  }

</bundles_post_ra>
